<compile_context>
chip_gen: v7x
topology: tpu7x:2x2x1
jax: 0.10.0
libtpu: 0.0.40
codegen_flags: <defaults>
</compile_context>

<pallas_src>
import functools

import jax
import jax.numpy as jnp
import numpy as np
from jax import lax
from jax.experimental import pallas as pl
from jax.experimental.pallas import tpu as pltpu

_SUBLANE_PACK_BF16 = 16      # bf16 rows per packed sublane tile
_FATK_MAX_C = 32             # fat-K im2col only at/below this (padded) channel count


def _round_up(x, m):
    return (x + m - 1) // m * m


def _vmem_capacity_bytes():
    try:
        info = pltpu.get_tpu_info()
        cap = getattr(info, "vmem_capacity_bytes", None)
        if cap:
            return int(cap)
    except Exception:
        pass
    return 64 * 1024 * 1024      # conservative fallback (v7x per-core VMEM)


def _conv3x3(buf_ref, pad, w_ref, W, L, fat_k):
    """3x3 'same' conv read from a flat-padded (C, pad + rows*W + pad) bf16 scratch.

    The output covers slab rows [1, 1 + L/W) (flat lanes [W, W+L) of the staged slab), so
    every dy in {-1,0,+1} tap is an in-bounds static slice; dx wrap-around across the row
    boundary is killed with a bit-select.  Returns (Cout, L) float32.
    """
    C = buf_ref.shape[0]
    col = lax.broadcasted_iota(jnp.int32, (1, L), 1) % W
    not_left = col > 0                   # output column w-1 exists
    not_right = col < (W - 1)            # output column w+1 exists
    base = pad + W
    taps = []
    for dy in (-1, 0, 1):
        for dx in (-1, 0, 1):
            start = base + dy * W + dx                  # static offset
            piece = buf_ref[:, start:start + L]         # lane-shifted view, (C, L) bf16
            if dx == -1:
                piece = jnp.where(not_left, piece, jnp.zeros_like(piece))
            elif dx == 1:
                piece = jnp.where(not_right, piece, jnp.zeros_like(piece))
            taps.append(piece)
    if fat_k:
        # Small C: one fat-K matmul; tap slabs are 16-row aligned (channels padded to 16).
        patches = jnp.concatenate(taps, axis=0)                          # (9C, L) bf16
        return jnp.dot(w_ref[...], patches, preferred_element_type=jnp.float32)
    # Large C: 9 accumulating K=C matmuls, no (9C, L) patches materialization.
    acc = jnp.zeros((w_ref.shape[0], L), jnp.float32)
    for i, piece in enumerate(taps):
        acc = acc + jnp.dot(w_ref[:, i * C:(i + 1) * C], piece,
                            preferred_element_type=jnp.float32)
    return acc


def _double_conv_kernel(x_ref, halo_ref, w1_ref, s1_ref, b1_ref,
                        w2_ref, s2_ref, b2_ref, o_ref, buf1, buf2,
                        *, W, tile_h, pad1, pad2, fatk1, fatk2):
    """One (batch, H-tile) step.

    x_ref   : (1, Cinp, tile_h*W)   bf16  body rows of the tile
    halo_ref: (1, Cinp, 4*W)        bf16  2 rows above + 2 rows below (zeros outside image)
    w*_ref  : (Coutp, 9*C)          bf16  conv weights (HWIO -> (Cout, ky, kx, Cin) flattened)
    s*/b*   : (Coutp, 1)            f32   BatchNorm scale / shift
    o_ref   : (1, Coutp, tile_h*W)        output tile
    buf1/2  : flat-padded bf16 staging scratch for the shifted-tap reads
    """
    t = pl.program_id(1)
    last_t = pl.num_programs(1) - 1
    Cout = o_ref.shape[1]
    L_in = (tile_h + 4) * W          # staged x slab: 2 halo | tile_h body | 2 halo rows
    L_h = (tile_h + 2) * W           # conv1 output: 1 halo | tile_h | 1 halo rows
    L_o = tile_h * W                 # conv2 / kernel output rows

    # ---- stage the x slab into the flat-padded scratch (pads never need zeroing) ----
    buf1[:, pad1:pad1 + 2 * W] = halo_ref[0, :, 0:2 * W]                       # rows r0-2..r0-1
    buf1[:, pad1 + 2 * W:pad1 + 2 * W + L_o] = x_ref[0]                        # rows r0..r0+th-1
    buf1[:, pad1 + (tile_h + 2) * W:pad1 + L_in] = halo_ref[0, :, 2 * W:4 * W]  # rows r0+th..+1

    # ---- conv1 -> BN1 (f32 scale/shift) -> ReLU on tile_h + 2 rows ----
    h = _conv3x3(buf1, pad1, w1_ref, W, L_h, fatk1)
    h = jnp.maximum(h * s1_ref[...] + b1_ref[...], 0.0)

    # ---- stage h; zero the halo rows that fall outside the image (conv2 'same' padding) ----
    buf2[:, pad2:pad2 + L_h] = h.astype(jnp.bfloat16)

    @pl.when(t == 0)
    def _():                         # h row (r0 - 1) is outside the image
        buf2[:, pad2:pad2 + W] = jnp.zeros((Cout, W), jnp.bfloat16)

    @pl.when(t == last_t)
    def _():                         # h row (r0 + tile_h) is outside the image
        buf2[:, pad2 + (tile_h + 1) * W:pad2 + L_h] = jnp.zeros((Cout, W), jnp.bfloat16)

    # ---- conv2 -> BN2 -> ReLU on the tile_h output rows ----
    y = _conv3x3(buf2, pad2, w2_ref, W, L_o, fatk2)
    y = jnp.maximum(y * s2_ref[...] + b2_ref[...], 0.0)
    o_ref[0] = y.astype(o_ref.dtype)


def _prep_w(w_hwio, cin_p, cout_p):
    _, _, cin, cout = w_hwio.shape
    w = jnp.pad(w_hwio, ((0, 0), (0, 0), (0, cin_p - cin), (0, cout_p - cout)))
    w = jnp.transpose(w, (3, 0, 1, 2))                 # (Coutp, 3, 3, Cinp)
    return w.reshape(cout_p, 9 * cin_p).astype(jnp.bfloat16)


def _prep_vec(v, cout_p):
    return jnp.pad(v.astype(jnp.float32), (0, cout_p - v.shape[0])).reshape(cout_p, 1)


def _build_halo(x_cp, tile_h):
    """(N, Cp, H, W) -> (N*n_t, Cp, 4*W): per tile the 2 rows above and 2 rows below it
    (zeros outside the image), pre-gathered so the halo is a plain BlockSpec input."""
    N, Cp, H, W = x_cp.shape
    n_t = H // tile_h
    x_rp = jnp.pad(x_cp, ((0, 0), (0, 0), (2, 2), (0, 0)))            # H -> H + 4 rows
    top = np.arange(n_t)[:, None] * tile_h + np.arange(2)[None, :]    # padded rows of r0-2, r0-1
    bot = top + tile_h + 2                                            # padded rows of r0+th, +1
    idx = np.concatenate([top, bot], axis=1).reshape(-1)              # t-major [t0, t1, b0, b1]
    halo = x_rp[:, :, idx, :]                                         # (N, Cp, 4*n_t, W)
    halo = halo.reshape(N, Cp, n_t, 4, W).transpose(0, 2, 1, 3, 4)
    return halo.reshape(N * n_t, Cp, 4 * W)


def _pick_tile_h(H, W, cin_p, cout_p, out_bytes, budget, fatk1, fatk2, n_batch):
    def est(th):
        L_in, L_h, L_o = (th + 4) * W, (th + 2) * W, th * W
        b = 2 * cin_p * L_o * 2                              # x body block (double-buffered bf16)
        b += 2 * cin_p * 4 * W * 2                           # halo block
        b += 2 * cout_p * L_o * out_bytes                    # output block
        b += cin_p * (L_in + 256) * 2 + cout_p * (L_h + 256) * 2        # staging scratch
        b += 4 * 9 * cin_p * cout_p + 4 * 9 * cout_p * cout_p + 32 * cout_p  # weights / BN
        b += cout_p * L_h * 4 + cout_p * L_h * 2 + cout_p * L_o * 4          # f32 / bf16 temps
        b += (9 * cin_p if fatk1 else 2 * cin_p) * L_h * 2                   # tap materialization
        b += (9 * cout_p if fatk2 else 2 * cout_p) * L_o * 2
        return b

    multi = [d for d in range(H - 1, 0, -1) if H % d == 0 and (d * W) % 128 == 0]
    fits = [d for d in [H] + multi if est(d) <= budget]
    if not fits:
        return multi[-1] if multi else H
    tile_h = fits[0]
    if n_batch == 1 and tile_h == H:
        smaller = [d for d in fits if d < H]
        if smaller:                       # >=2 H-steps so both v7x TensorCores get work at N=1
            tile_h = smaller[0]
    return tile_h


def double_conv2d(x_nchw, w1_hwio, scale1, shift1, w2_hwio, scale2, shift2, *,
                  tile_h=None, out_dtype=jnp.float32, fatk_max_c=_FATK_MAX_C):
    """x_nchw: (N, Cin, H, W) f32.  Conv weights in HWIO.  BN as folded per-channel
    scale/shift (inference).  Returns (N, Cout, H, W) in `out_dtype`."""
    N, Cin, H, W = x_nchw.shape
    Cout = w1_hwio.shape[-1]
    cin_p = _round_up(Cin, _SUBLANE_PACK_BF16)
    cout_p = _round_up(Cout, _SUBLANE_PACK_BF16)
    fatk1 = cin_p <= fatk_max_c
    fatk2 = cout_p <= fatk_max_c
    out_bytes = jnp.dtype(out_dtype).itemsize

    budget = min(_vmem_capacity_bytes() * 3 // 4, 100 * 1024 * 1024)
    if tile_h is None:
        tile_h = _pick_tile_h(H, W, cin_p, cout_p, out_bytes, budget, fatk1, fatk2, N)
    assert H % tile_h == 0 and (tile_h == H or (tile_h * W) % 128 == 0), (
        "tile_h must divide H and give a 128-lane-aligned tile")
    n_t = H // tile_h

    # Host-side prep (cheap): bf16 cast, channel pad to the sublane pack, halo gather, layouts.
    xb = jnp.pad(x_nchw.astype(jnp.bfloat16), ((0, 0), (0, cin_p - Cin), (0, 0), (0, 0)))
    x_main = xb.reshape(N, cin_p, H * W)
    halo = _build_halo(xb, tile_h)

    w1e = _prep_w(w1_hwio, cin_p, cout_p)
    w2e = _prep_w(w2_hwio, cout_p, cout_p)
    s1 = _prep_vec(scale1, cout_p)
    b1 = _prep_vec(shift1, cout_p)
    s2 = _prep_vec(scale2, cout_p)
    b2 = _prep_vec(shift2, cout_p)

    pad1 = (-2 * W) % 128 or 128          # main staging store lands 128-lane aligned
    pad2 = 128

    kernel = functools.partial(_double_conv_kernel, W=W, tile_h=tile_h,
                               pad1=pad1, pad2=pad2, fatk1=fatk1, fatk2=fatk2)

    out = pl.pallas_call(
        kernel,
        out_shape=jax.ShapeDtypeStruct((N, cout_p, H * W), out_dtype),
        grid_spec=pltpu.PrefetchScalarGridSpec(
            num_scalar_prefetch=0,
            grid=(N, n_t),
            in_specs=[
                pl.BlockSpec((1, cin_p, tile_h * W), lambda n, t: (n, 0, t)),
                pl.BlockSpec((1, cin_p, 4 * W), lambda n, t: (n * n_t + t, 0, 0)),
                pl.BlockSpec((cout_p, 9 * cin_p), lambda n, t: (0, 0)),
                pl.BlockSpec((cout_p, 1), lambda n, t: (0, 0)),
                pl.BlockSpec((cout_p, 1), lambda n, t: (0, 0)),
                pl.BlockSpec((cout_p, 9 * cout_p), lambda n, t: (0, 0)),
                pl.BlockSpec((cout_p, 1), lambda n, t: (0, 0)),
                pl.BlockSpec((cout_p, 1), lambda n, t: (0, 0)),
            ],
            out_specs=pl.BlockSpec((1, cout_p, tile_h * W), lambda n, t: (n, 0, t)),
            scratch_shapes=[
                pltpu.VMEM((cin_p, pad1 + (tile_h + 4) * W + 128), jnp.bfloat16),
                pltpu.VMEM((cout_p, pad2 + (tile_h + 2) * W + 128), jnp.bfloat16),
            ],
        ),
        compiler_params=pltpu.CompilerParams(
            dimension_semantics=("parallel", "parallel"),
            vmem_limit_bytes=int(budget)),
    )(x_main, halo, w1e, s1, b1, w2e, s2, b2)

    return out.reshape(N, cout_p, H, W)[:, :Cout].astype(out_dtype)


def _ref_double_conv(x_nchw, w1, scale1, shift1, w2, scale2, shift2):
    """Pure-JAX f32 reference (lax conv) for correctness checking."""
    def conv(x, w_hwio):
        return lax.conv_general_dilated(
            x, w_hwio, window_strides=(1, 1), padding='SAME',
            dimension_numbers=('NCHW', 'HWIO', 'NCHW'))
    h = conv(x_nchw, w1)
    h = jnp.maximum(h * scale1[None, :, None, None] + shift1[None, :, None, None], 0.0)
    y = conv(h, w2)
    return jnp.maximum(y * scale2[None, :, None, None] + shift2[None, :, None, None], 0.0)


if __name__ == "__main__":
    # Small deterministic setup: batch=2, in_channels=4, out_channels=8, 16x16 spatial.
    N, CIN, COUT, H, W = 2, 4, 8, 16, 16
    EPS = 1e-5

    key = jax.random.PRNGKey(0)
    kx, kw1, kw2, kg1, kb1, km1, kv1, kg2, kb2, km2, kv2 = jax.random.split(key, 11)

    x = jax.random.normal(kx, (N, CIN, H, W), jnp.float32)
    w1 = jax.random.normal(kw1, (3, 3, CIN, COUT), jnp.float32) / np.sqrt(9 * CIN)
    w2 = jax.random.normal(kw2, (3, 3, COUT, COUT), jnp.float32) / np.sqrt(9 * COUT)

    g1 = 1.0 + 0.1 * jax.random.normal(kg1, (COUT,), jnp.float32)
    be1 = 0.1 * jax.random.normal(kb1, (COUT,), jnp.float32)
    m1 = 0.1 * jax.random.normal(km1, (COUT,), jnp.float32)
    v1 = 1.0 + 0.5 * jax.random.uniform(kv1, (COUT,), jnp.float32)
    g2 = 1.0 + 0.1 * jax.random.normal(kg2, (COUT,), jnp.float32)
    be2 = 0.1 * jax.random.normal(kb2, (COUT,), jnp.float32)
    m2 = 0.1 * jax.random.normal(km2, (COUT,), jnp.float32)
    v2 = 1.0 + 0.5 * jax.random.uniform(kv2, (COUT,), jnp.float32)

    # Fold BN (inference, running stats) into per-channel scale/shift.
    scale1 = g1 / jnp.sqrt(v1 + EPS)
    shift1 = be1 - m1 * scale1
    scale2 = g2 / jnp.sqrt(v2 + EPS)
    shift2 = be2 - m2 * scale2

    ref = jax.block_until_ready(
        _ref_double_conv(x, w1, scale1, shift1, w2, scale2, shift2))

    # 1) auto tile size (single H-tile at this toy size), fat-K im2col path.
    out_a = jax.block_until_ready(
        double_conv2d(x, w1, scale1, shift1, w2, scale2, shift2))
    # 2) explicit H-tiling (two 8-row tiles) -> exercises the halo / boundary path.
    out_b = jax.block_until_ready(
        double_conv2d(x, w1, scale1, shift1, w2, scale2, shift2, tile_h=8))
    # 3) same tiling, forcing the large-C accumulating-matmul path.
    out_c = jax.block_until_ready(
        double_conv2d(x, w1, scale1, shift1, w2, scale2, shift2, tile_h=8, fatk_max_c=0))

    for out in (out_a, out_b, out_c):
        assert out.shape == (N, COUT, H, W), out.shape
        # bf16 MXU operands with f32 accumulation (BN scale applied in f32 post-matmul).
        np.testing.assert_allclose(np.asarray(out), np.asarray(ref), rtol=2e-2, atol=2e-2)
    print("KERNEL_OK")
</pallas_src>

<mosaic_0001>
module attributes {stable_mosaic.version = 11 : i64} {
  func.func @_double_conv_kernel(%arg0: i32, %arg1: i32, %arg2: memref<1x16x256xbf16, #tpu.memory_space<vmem>>, %arg3: memref<1x16x64xbf16, #tpu.memory_space<vmem>>, %arg4: memref<16x144xbf16, #tpu.memory_space<vmem>>, %arg5: memref<16x1xf32, #tpu.memory_space<vmem>>, %arg6: memref<16x1xf32, #tpu.memory_space<vmem>>, %arg7: memref<16x144xbf16, #tpu.memory_space<vmem>>, %arg8: memref<16x1xf32, #tpu.memory_space<vmem>>, %arg9: memref<16x1xf32, #tpu.memory_space<vmem>>, %arg10: memref<1x16x256xf32, #tpu.memory_space<vmem>>, %arg11: memref<16x544xbf16, #tpu.memory_space<vmem>>, %arg12: memref<16x544xbf16, #tpu.memory_space<vmem>>) attributes {dimension_semantics = [#tpu.dimension_semantics<parallel>, #tpu.dimension_semantics<parallel>], iteration_bounds = array<i64: 2, 1>, scalar_prefetch = 0 : i64, scratch_operands = 2 : i64, tpu.core_type = #tpu.core_type<tc>, window_params = [{transform_indices = @transform_0, window_bounds = array<i64: 1, 16, 256>}, {transform_indices = @transform_1, window_bounds = array<i64: 1, 16, 64>}, {pipeline_mode = #tpu.pipeline_mode<synchronous>, transform_indices = @transform_2, window_bounds = array<i64: 16, 144>}, {pipeline_mode = #tpu.pipeline_mode<synchronous>, transform_indices = @transform_3, window_bounds = array<i64: 16, 1>}, {pipeline_mode = #tpu.pipeline_mode<synchronous>, transform_indices = @transform_4, window_bounds = array<i64: 16, 1>}, {pipeline_mode = #tpu.pipeline_mode<synchronous>, transform_indices = @transform_5, window_bounds = array<i64: 16, 144>}, {pipeline_mode = #tpu.pipeline_mode<synchronous>, transform_indices = @transform_6, window_bounds = array<i64: 16, 1>}, {pipeline_mode = #tpu.pipeline_mode<synchronous>, transform_indices = @transform_7, window_bounds = array<i64: 16, 1>}, {transform_indices = @transform_8, window_bounds = array<i64: 1, 16, 256>}]} {
    %c0 = arith.constant 0 : index
    %c0_0 = arith.constant 0 : index
    %c0_1 = arith.constant 0 : index
    %0 = vector.load %arg3[%c0, %c0_0, %c0_1] : memref<1x16x64xbf16, #tpu.memory_space<vmem>>, vector<1x16x32xbf16>
    %1 = vector.shape_cast %0 : vector<1x16x32xbf16> to vector<16x32xbf16>
    %c0_2 = arith.constant 0 : index
    %c96 = arith.constant 96 : index
    %2 = vector.load %arg11[%c0_2, %c96] : memref<16x544xbf16, #tpu.memory_space<vmem>>, vector<16x32xbf16>
    tpu.vector_store %arg11[%c0_2, %c96], %1 {strides = array<i32>} : memref<16x544xbf16, #tpu.memory_space<vmem>>, vector<16x32xbf16>,
    %c0_3 = arith.constant 0 : index
    %c0_4 = arith.constant 0 : index
    %c0_5 = arith.constant 0 : index
    %3 = vector.load %arg2[%c0_3, %c0_4, %c0_5] : memref<1x16x256xbf16, #tpu.memory_space<vmem>>, vector<1x16x256xbf16>
    %4 = vector.shape_cast %3 : vector<1x16x256xbf16> to vector<16x256xbf16>
    %c0_6 = arith.constant 0 : index
    %c128 = arith.constant 128 : index
    %5 = vector.load %arg11[%c0_6, %c128] : memref<16x544xbf16, #tpu.memory_space<vmem>>, vector<16x256xbf16>
    tpu.vector_store %arg11[%c0_6, %c128], %4 {strides = array<i32>} : memref<16x544xbf16, #tpu.memory_space<vmem>>, vector<16x256xbf16>,
    %c0_7 = arith.constant 0 : index
    %c0_8 = arith.constant 0 : index
    %c32 = arith.constant 32 : index
    %6 = vector.load %arg3[%c0_7, %c0_8, %c32] : memref<1x16x64xbf16, #tpu.memory_space<vmem>>, vector<1x16x32xbf16>
    %7 = vector.shape_cast %6 : vector<1x16x32xbf16> to vector<16x32xbf16>
    %c0_9 = arith.constant 0 : index
    %c384 = arith.constant 384 : index
    %8 = vector.load %arg11[%c0_9, %c384] : memref<16x544xbf16, #tpu.memory_space<vmem>>, vector<16x32xbf16>
    tpu.vector_store %arg11[%c0_9, %c384], %7 {strides = array<i32>} : memref<16x544xbf16, #tpu.memory_space<vmem>>, vector<16x32xbf16>,
    %9 = tpu.iota {dimensions = array<i32: 1>} : vector<1x288xi32>
    %c16_i32 = arith.constant 16 : i32
    %c0_i32 = arith.constant 0 : i32
    %10 = arith.cmpi eq, %c16_i32, %c0_i32 : i32
    %c1_i32 = arith.constant 1 : i32
    %11 = arith.select %10, %c1_i32, %c16_i32 : i32
    %12 = vector.broadcast %11 : i32 to vector<1x288xi32>
    %13 = arith.remsi %9, %12 : vector<1x288xi32>
    %c0_i32_10 = arith.constant 0 : i32
    %14 = vector.broadcast %c0_i32_10 : i32 to vector<1x288xi32>
    %15 = arith.cmpi ne, %13, %14 : vector<1x288xi32>
    %c0_i32_11 = arith.constant 0 : i32
    %16 = vector.broadcast %c0_i32_11 : i32 to vector<1x288xi32>
    %17 = arith.cmpi slt, %13, %16 : vector<1x288xi32>
    %c0_i32_12 = arith.constant 0 : i32
    %18 = arith.cmpi slt, %11, %c0_i32_12 : i32
    %19 = vector.broadcast %18 : i1 to vector<1x288xi1>
    %20 = vector.broadcast %19 : vector<1x288xi1> to vector<1x288xi1>
    %21 = arith.xori %17, %20 : vector<1x288xi1>
    %22 = arith.andi %21, %15 : vector<1x288xi1>
    %23 = vector.broadcast %11 : i32 to vector<1x288xi32>
    %24 = arith.addi %13, %23 : vector<1x288xi32>
    %25 = arith.select %22, %24, %13 : vector<1x288xi1>, vector<1x288xi32>
    %c0_i32_13 = arith.constant 0 : i32
    %26 = vector.broadcast %c0_i32_13 : i32 to vector<1x288xi32>
    %27 = arith.cmpi sgt, %25, %26 : vector<1x288xi32>
    %c15_i32 = arith.constant 15 : i32
    %28 = vector.broadcast %c15_i32 : i32 to vector<1x288xi32>
    %29 = arith.cmpi slt, %25, %28 : vector<1x288xi32>
    %c0_14 = arith.constant 0 : index
    %c95 = arith.constant 95 : index
    %30 = vector.load %arg11[%c0_14, %c95] : memref<16x544xbf16, #tpu.memory_space<vmem>>, vector<16x288xbf16>
    %cst = arith.constant 0.000000e+00 : bf16
    %31 = vector.broadcast %cst : bf16 to vector<16x288xbf16>
    %32 = vector.shape_cast %27 : vector<1x288xi1> to vector<1x288xi1>
    %33 = vector.broadcast %32 : vector<1x288xi1> to vector<16x288xi1>
    %34 = arith.select %33, %30, %31 : vector<16x288xi1>, vector<16x288xbf16>
    %c0_15 = arith.constant 0 : index
    %c96_16 = arith.constant 96 : index
    %35 = vector.load %arg11[%c0_15, %c96_16] : memref<16x544xbf16, #tpu.memory_space<vmem>>, vector<16x288xbf16>
    %c0_17 = arith.constant 0 : index
    %c97 = arith.constant 97 : index
    %36 = vector.load %arg11[%c0_17, %c97] : memref<16x544xbf16, #tpu.memory_space<vmem>>, vector<16x288xbf16>
    %cst_18 = arith.constant 0.000000e+00 : bf16
    %37 = vector.broadcast %cst_18 : bf16 to vector<16x288xbf16>
    %38 = vector.shape_cast %29 : vector<1x288xi1> to vector<1x288xi1>
    %39 = vector.broadcast %38 : vector<1x288xi1> to vector<16x288xi1>
    %40 = arith.select %39, %36, %37 : vector<16x288xi1>, vector<16x288xbf16>
    %c0_19 = arith.constant 0 : index
    %c111 = arith.constant 111 : index
    %41 = vector.load %arg11[%c0_19, %c111] : memref<16x544xbf16, #tpu.memory_space<vmem>>, vector<16x288xbf16>
    %cst_20 = arith.constant 0.000000e+00 : bf16
    %42 = vector.broadcast %cst_20 : bf16 to vector<16x288xbf16>
    %43 = vector.shape_cast %27 : vector<1x288xi1> to vector<1x288xi1>
    %44 = vector.broadcast %43 : vector<1x288xi1> to vector<16x288xi1>
    %45 = arith.select %44, %41, %42 : vector<16x288xi1>, vector<16x288xbf16>
    %c0_21 = arith.constant 0 : index
    %c112 = arith.constant 112 : index
    %46 = vector.load %arg11[%c0_21, %c112] : memref<16x544xbf16, #tpu.memory_space<vmem>>, vector<16x288xbf16>
    %c0_22 = arith.constant 0 : index
    %c113 = arith.constant 113 : index
    %47 = vector.load %arg11[%c0_22, %c113] : memref<16x544xbf16, #tpu.memory_space<vmem>>, vector<16x288xbf16>
    %cst_23 = arith.constant 0.000000e+00 : bf16
    %48 = vector.broadcast %cst_23 : bf16 to vector<16x288xbf16>
    %49 = vector.shape_cast %29 : vector<1x288xi1> to vector<1x288xi1>
    %50 = vector.broadcast %49 : vector<1x288xi1> to vector<16x288xi1>
    %51 = arith.select %50, %47, %48 : vector<16x288xi1>, vector<16x288xbf16>
    %c0_24 = arith.constant 0 : index
    %c127 = arith.constant 127 : index
    %52 = vector.load %arg11[%c0_24, %c127] : memref<16x544xbf16, #tpu.memory_space<vmem>>, vector<16x288xbf16>
    %cst_25 = arith.constant 0.000000e+00 : bf16
    %53 = vector.broadcast %cst_25 : bf16 to vector<16x288xbf16>
    %54 = vector.shape_cast %27 : vector<1x288xi1> to vector<1x288xi1>
    %55 = vector.broadcast %54 : vector<1x288xi1> to vector<16x288xi1>
    %56 = arith.select %55, %52, %53 : vector<16x288xi1>, vector<16x288xbf16>
    %c0_26 = arith.constant 0 : index
    %c128_27 = arith.constant 128 : index
    %57 = vector.load %arg11[%c0_26, %c128_27] : memref<16x544xbf16, #tpu.memory_space<vmem>>, vector<16x288xbf16>
    %c0_28 = arith.constant 0 : index
    %c129 = arith.constant 129 : index
    %58 = vector.load %arg11[%c0_28, %c129] : memref<16x544xbf16, #tpu.memory_space<vmem>>, vector<16x288xbf16>
    %cst_29 = arith.constant 0.000000e+00 : bf16
    %59 = vector.broadcast %cst_29 : bf16 to vector<16x288xbf16>
    %60 = vector.shape_cast %29 : vector<1x288xi1> to vector<1x288xi1>
    %61 = vector.broadcast %60 : vector<1x288xi1> to vector<16x288xi1>
    %62 = arith.select %61, %58, %59 : vector<16x288xi1>, vector<16x288xbf16>
    %63 = tpu.concatenate %34, %35, %40, %45, %46, %51, %56, %57, %62 in 0 : vector<16x288xbf16>, vector<16x288xbf16>, vector<16x288xbf16>, vector<16x288xbf16>, vector<16x288xbf16>, vector<16x288xbf16>, vector<16x288xbf16>, vector<16x288xbf16>, vector<16x288xbf16> -> vector<144x288xbf16>
    %c0_30 = arith.constant 0 : index
    %c0_31 = arith.constant 0 : index
    %64 = vector.load %arg4[%c0_30, %c0_31] : memref<16x144xbf16, #tpu.memory_space<vmem>>, vector<16x144xbf16>
    %cst_32 = arith.constant dense<0.000000e+00> : vector<16x288xf32>
    %65 = tpu.matmul %64, %63, %cst_32 {dimension_numbers = #tpu.dot_dimension_numbers<[1], [0], [0], [1], [0, 0, 1, 1], [], []>} : vector<16x144xbf16>, vector<144x288xbf16>, vector<16x288xf32> -> vector<16x288xf32>
    %c0_33 = arith.constant 0 : index
    %c0_34 = arith.constant 0 : index
    %66 = vector.load %arg5[%c0_33, %c0_34] : memref<16x1xf32, #tpu.memory_space<vmem>>, vector<16x1xf32>
    %67 = vector.broadcast %66 : vector<16x1xf32> to vector<16x288xf32>
    %68 = arith.mulf %65, %67 : vector<16x288xf32>
    %c0_35 = arith.constant 0 : index
    %c0_36 = arith.constant 0 : index
    %69 = vector.load %arg6[%c0_35, %c0_36] : memref<16x1xf32, #tpu.memory_space<vmem>>, vector<16x1xf32>
    %70 = vector.broadcast %69 : vector<16x1xf32> to vector<16x288xf32>
    %71 = arith.addf %68, %70 : vector<16x288xf32>
    %cst_37 = arith.constant 0.000000e+00 : f32
    %72 = vector.broadcast %cst_37 : f32 to vector<16x288xf32>
    %73 = arith.maximumf %71, %72 : vector<16x288xf32>
    %74 = arith.truncf %73 : vector<16x288xf32> to vector<16x288xbf16>
    %c0_38 = arith.constant 0 : index
    %c128_39 = arith.constant 128 : index
    %75 = vector.load %arg12[%c0_38, %c128_39] : memref<16x544xbf16, #tpu.memory_space<vmem>>, vector<16x288xbf16>
    tpu.vector_store %arg12[%c0_38, %c128_39], %74 {strides = array<i32>} : memref<16x544xbf16, #tpu.memory_space<vmem>>, vector<16x288xbf16>,
    %c0_i32_40 = arith.constant 0 : i32
    %76 = arith.cmpi eq, %arg1, %c0_i32_40 : i32
    %77 = arith.extui %76 : i1 to i32
    %c0_i32_41 = arith.constant 0 : i32
    %78 = arith.cmpi ne, %77, %c0_i32_41 : i32
    scf.if %78 {
      %cst_81 = arith.constant 0.000000e+00 : bf16
      %150 = vector.broadcast %cst_81 : bf16 to vector<16x16xbf16>
      %c0_82 = arith.constant 0 : index
      %c128_83 = arith.constant 128 : index
      %151 = vector.load %arg12[%c0_82, %c128_83] : memref<16x544xbf16, #tpu.memory_space<vmem>>, vector<16x16xbf16>
      tpu.vector_store %arg12[%c0_82, %c128_83], %150 {strides = array<i32>} : memref<16x544xbf16, #tpu.memory_space<vmem>>, vector<16x16xbf16>,
    } else {
    }
    %c0_i32_42 = arith.constant 0 : i32
    %79 = arith.cmpi eq, %arg1, %c0_i32_42 : i32
    %80 = arith.extui %79 : i1 to i32
    %c0_i32_43 = arith.constant 0 : i32
    %81 = arith.cmpi ne, %80, %c0_i32_43 : i32
    scf.if %81 {
      %cst_81 = arith.constant 0.000000e+00 : bf16
      %150 = vector.broadcast %cst_81 : bf16 to vector<16x16xbf16>
      %c0_82 = arith.constant 0 : index
      %c400 = arith.constant 400 : index
      %151 = vector.load %arg12[%c0_82, %c400] : memref<16x544xbf16, #tpu.memory_space<vmem>>, vector<16x16xbf16>
      tpu.vector_store %arg12[%c0_82, %c400], %150 {strides = array<i32>} : memref<16x544xbf16, #tpu.memory_space<vmem>>, vector<16x16xbf16>,
    } else {
    }
    %82 = tpu.iota {dimensions = array<i32: 1>} : vector<1x256xi32>
    %c16_i32_44 = arith.constant 16 : i32
    %c0_i32_45 = arith.constant 0 : i32
    %83 = arith.cmpi eq, %c16_i32_44, %c0_i32_45 : i32
    %c1_i32_46 = arith.constant 1 : i32
    %84 = arith.select %83, %c1_i32_46, %c16_i32_44 : i32
    %85 = vector.broadcast %84 : i32 to vector<1x256xi32>
    %86 = arith.remsi %82, %85 : vector<1x256xi32>
    %c0_i32_47 = arith.constant 0 : i32
    %87 = vector.broadcast %c0_i32_47 : i32 to vector<1x256xi32>
    %88 = arith.cmpi ne, %86, %87 : vector<1x256xi32>
    %c0_i32_48 = arith.constant 0 : i32
    %89 = vector.broadcast %c0_i32_48 : i32 to vector<1x256xi32>
    %90 = arith.cmpi slt, %86, %89 : vector<1x256xi32>
    %c0_i32_49 = arith.constant 0 : i32
    %91 = arith.cmpi slt, %84, %c0_i32_49 : i32
    %92 = vector.broadcast %91 : i1 to vector<1x256xi1>
    %93 = vector.broadcast %92 : vector<1x256xi1> to vector<1x256xi1>
    %94 = arith.xori %90, %93 : vector<1x256xi1>
    %95 = arith.andi %94, %88 : vector<1x256xi1>
    %96 = vector.broadcast %84 : i32 to vector<1x256xi32>
    %97 = arith.addi %86, %96 : vector<1x256xi32>
    %98 = arith.select %95, %97, %86 : vector<1x256xi1>, vector<1x256xi32>
    %c0_i32_50 = arith.constant 0 : i32
    %99 = vector.broadcast %c0_i32_50 : i32 to vector<1x256xi32>
    %100 = arith.cmpi sgt, %98, %99 : vector<1x256xi32>
    %c15_i32_51 = arith.constant 15 : i32
    %101 = vector.broadcast %c15_i32_51 : i32 to vector<1x256xi32>
    %102 = arith.cmpi slt, %98, %101 : vector<1x256xi32>
    %c0_52 = arith.constant 0 : index
    %c127_53 = arith.constant 127 : index
    %103 = vector.load %arg12[%c0_52, %c127_53] : memref<16x544xbf16, #tpu.memory_space<vmem>>, vector<16x256xbf16>
    %cst_54 = arith.constant 0.000000e+00 : bf16
    %104 = vector.broadcast %cst_54 : bf16 to vector<16x256xbf16>
    %105 = vector.shape_cast %100 : vector<1x256xi1> to vector<1x256xi1>
    %106 = vector.broadcast %105 : vector<1x256xi1> to vector<16x256xi1>
    %107 = arith.select %106, %103, %104 : vector<16x256xi1>, vector<16x256xbf16>
    %c0_55 = arith.constant 0 : index
    %c128_56 = arith.constant 128 : index
    %108 = vector.load %arg12[%c0_55, %c128_56] : memref<16x544xbf16, #tpu.memory_space<vmem>>, vector<16x256xbf16>
    %c0_57 = arith.constant 0 : index
    %c129_58 = arith.constant 129 : index
    %109 = vector.load %arg12[%c0_57, %c129_58] : memref<16x544xbf16, #tpu.memory_space<vmem>>, vector<16x256xbf16>
    %cst_59 = arith.constant 0.000000e+00 : bf16
    %110 = vector.broadcast %cst_59 : bf16 to vector<16x256xbf16>
    %111 = vector.shape_cast %102 : vector<1x256xi1> to vector<1x256xi1>
    %112 = vector.broadcast %111 : vector<1x256xi1> to vector<16x256xi1>
    %113 = arith.select %112, %109, %110 : vector<16x256xi1>, vector<16x256xbf16>
    %c0_60 = arith.constant 0 : index
    %c143 = arith.constant 143 : index
    %114 = vector.load %arg12[%c0_60, %c143] : memref<16x544xbf16, #tpu.memory_space<vmem>>, vector<16x256xbf16>
    %cst_61 = arith.constant 0.000000e+00 : bf16
    %115 = vector.broadcast %cst_61 : bf16 to vector<16x256xbf16>
    %116 = vector.shape_cast %100 : vector<1x256xi1> to vector<1x256xi1>
    %117 = vector.broadcast %116 : vector<1x256xi1> to vector<16x256xi1>
    %118 = arith.select %117, %114, %115 : vector<16x256xi1>, vector<16x256xbf16>
    %c0_62 = arith.constant 0 : index
    %c144 = arith.constant 144 : index
    %119 = vector.load %arg12[%c0_62, %c144] : memref<16x544xbf16, #tpu.memory_space<vmem>>, vector<16x256xbf16>
    %c0_63 = arith.constant 0 : index
    %c145 = arith.constant 145 : index
    %120 = vector.load %arg12[%c0_63, %c145] : memref<16x544xbf16, #tpu.memory_space<vmem>>, vector<16x256xbf16>
    %cst_64 = arith.constant 0.000000e+00 : bf16
    %121 = vector.broadcast %cst_64 : bf16 to vector<16x256xbf16>
    %122 = vector.shape_cast %102 : vector<1x256xi1> to vector<1x256xi1>
    %123 = vector.broadcast %122 : vector<1x256xi1> to vector<16x256xi1>
    %124 = arith.select %123, %120, %121 : vector<16x256xi1>, vector<16x256xbf16>
    %c0_65 = arith.constant 0 : index
    %c159 = arith.constant 159 : index
    %125 = vector.load %arg12[%c0_65, %c159] : memref<16x544xbf16, #tpu.memory_space<vmem>>, vector<16x256xbf16>
    %cst_66 = arith.constant 0.000000e+00 : bf16
    %126 = vector.broadcast %cst_66 : bf16 to vector<16x256xbf16>
    %127 = vector.shape_cast %100 : vector<1x256xi1> to vector<1x256xi1>
    %128 = vector.broadcast %127 : vector<1x256xi1> to vector<16x256xi1>
    %129 = arith.select %128, %125, %126 : vector<16x256xi1>, vector<16x256xbf16>
    %c0_67 = arith.constant 0 : index
    %c160 = arith.constant 160 : index
    %130 = vector.load %arg12[%c0_67, %c160] : memref<16x544xbf16, #tpu.memory_space<vmem>>, vector<16x256xbf16>
    %c0_68 = arith.constant 0 : index
    %c161 = arith.constant 161 : index
    %131 = vector.load %arg12[%c0_68, %c161] : memref<16x544xbf16, #tpu.memory_space<vmem>>, vector<16x256xbf16>
    %cst_69 = arith.constant 0.000000e+00 : bf16
    %132 = vector.broadcast %cst_69 : bf16 to vector<16x256xbf16>
    %133 = vector.shape_cast %102 : vector<1x256xi1> to vector<1x256xi1>
    %134 = vector.broadcast %133 : vector<1x256xi1> to vector<16x256xi1>
    %135 = arith.select %134, %131, %132 : vector<16x256xi1>, vector<16x256xbf16>
    %136 = tpu.concatenate %107, %108, %113, %118, %119, %124, %129, %130, %135 in 0 : vector<16x256xbf16>, vector<16x256xbf16>, vector<16x256xbf16>, vector<16x256xbf16>, vector<16x256xbf16>, vector<16x256xbf16>, vector<16x256xbf16>, vector<16x256xbf16>, vector<16x256xbf16> -> vector<144x256xbf16>
    %c0_70 = arith.constant 0 : index
    %c0_71 = arith.constant 0 : index
    %137 = vector.load %arg7[%c0_70, %c0_71] : memref<16x144xbf16, #tpu.memory_space<vmem>>, vector<16x144xbf16>
    %cst_72 = arith.constant dense<0.000000e+00> : vector<16x256xf32>
    %138 = tpu.matmul %137, %136, %cst_72 {dimension_numbers = #tpu.dot_dimension_numbers<[1], [0], [0], [1], [0, 0, 1, 1], [], []>} : vector<16x144xbf16>, vector<144x256xbf16>, vector<16x256xf32> -> vector<16x256xf32>
    %c0_73 = arith.constant 0 : index
    %c0_74 = arith.constant 0 : index
    %139 = vector.load %arg8[%c0_73, %c0_74] : memref<16x1xf32, #tpu.memory_space<vmem>>, vector<16x1xf32>
    %140 = vector.broadcast %139 : vector<16x1xf32> to vector<16x256xf32>
    %141 = arith.mulf %138, %140 : vector<16x256xf32>
    %c0_75 = arith.constant 0 : index
    %c0_76 = arith.constant 0 : index
    %142 = vector.load %arg9[%c0_75, %c0_76] : memref<16x1xf32, #tpu.memory_space<vmem>>, vector<16x1xf32>
    %143 = vector.broadcast %142 : vector<16x1xf32> to vector<16x256xf32>
    %144 = arith.addf %141, %143 : vector<16x256xf32>
    %cst_77 = arith.constant 0.000000e+00 : f32
    %145 = vector.broadcast %cst_77 : f32 to vector<16x256xf32>
    %146 = arith.maximumf %144, %145 : vector<16x256xf32>
    %c0_78 = arith.constant 0 : index
    %c0_79 = arith.constant 0 : index
    %c0_80 = arith.constant 0 : index
    %147 = vector.load %arg10[%c0_78, %c0_79, %c0_80] : memref<1x16x256xf32, #tpu.memory_space<vmem>>, vector<1x16x256xf32>
    %148 = vector.shape_cast %147 : vector<1x16x256xf32> to vector<16x256xf32>
    %149 = vector.shape_cast %146 : vector<16x256xf32> to vector<1x16x256xf32>
    tpu.vector_store %arg10[%c0_78, %c0_79, %c0_80], %149 {strides = array<i32>} : memref<1x16x256xf32, #tpu.memory_space<vmem>>, vector<1x16x256xf32>,
    return
  }
  func.func @transform_0(%arg0: i32, %arg1: i32) -> (i32, i32, i32) {
    %c0_i32 = arith.constant 0 : i32
    %c0_i32_0 = arith.constant 0 : i32
    return %arg0, %c0_i32, %arg1 : i32, i32, i32
  }
  func.func @transform_1(%arg0: i32, %arg1: i32) -> (i32, i32, i32) {
    %c1_i32 = arith.constant 1 : i32
    %0 = arith.muli %arg0, %c1_i32 : i32
    %1 = arith.addi %0, %arg1 : i32
    %c0_i32 = arith.constant 0 : i32
    %c0_i32_0 = arith.constant 0 : i32
    %c0_i32_1 = arith.constant 0 : i32
    return %1, %c0_i32, %c0_i32_0 : i32, i32, i32
  }
  func.func @transform_2(%arg0: i32, %arg1: i32) -> (i32, i32) {
    %c0_i32 = arith.constant 0 : i32
    %c0_i32_0 = arith.constant 0 : i32
    %c0_i32_1 = arith.constant 0 : i32
    return %c0_i32, %c0_i32_0 : i32, i32
  }
  func.func @transform_3(%arg0: i32, %arg1: i32) -> (i32, i32) {
    %c0_i32 = arith.constant 0 : i32
    %c0_i32_0 = arith.constant 0 : i32
    %c0_i32_1 = arith.constant 0 : i32
    return %c0_i32, %c0_i32_0 : i32, i32
  }
  func.func @transform_4(%arg0: i32, %arg1: i32) -> (i32, i32) {
    %c0_i32 = arith.constant 0 : i32
    %c0_i32_0 = arith.constant 0 : i32
    %c0_i32_1 = arith.constant 0 : i32
    return %c0_i32, %c0_i32_0 : i32, i32
  }
  func.func @transform_5(%arg0: i32, %arg1: i32) -> (i32, i32) {
    %c0_i32 = arith.constant 0 : i32
    %c0_i32_0 = arith.constant 0 : i32
    %c0_i32_1 = arith.constant 0 : i32
    return %c0_i32, %c0_i32_0 : i32, i32
  }
  func.func @transform_6(%arg0: i32, %arg1: i32) -> (i32, i32) {
    %c0_i32 = arith.constant 0 : i32
    %c0_i32_0 = arith.constant 0 : i32
    %c0_i32_1 = arith.constant 0 : i32
    return %c0_i32, %c0_i32_0 : i32, i32
  }
  func.func @transform_7(%arg0: i32, %arg1: i32) -> (i32, i32) {
    %c0_i32 = arith.constant 0 : i32
    %c0_i32_0 = arith.constant 0 : i32
    %c0_i32_1 = arith.constant 0 : i32
    return %c0_i32, %c0_i32_0 : i32, i32
  }
  func.func @transform_8(%arg0: i32, %arg1: i32) -> (i32, i32, i32) {
    %c0_i32 = arith.constant 0 : i32
    %c0_i32_0 = arith.constant 0 : i32
    return %arg0, %c0_i32, %arg1 : i32, i32, i32
  }
}

</mosaic_0001>

<bundles_post_ra>
// kernel: tpu_custom_call.1
= control target key start
LH: loop header
LB: loop body
LE: loop exit
PB: predicated region body
PF: predicated region fallthrough
CT: control target
= control target key end

     0   :  { %13 = vsyncpa [#allocation5], 0  ;;  %s2155_s0 = inlined_call_operand.vmem [shape: bf16[2,16,256], index: 0, kind: input, shape index: {}]   ;;  %s2156_s1 = inlined_call_operand.vmem [shape: bf16[2,16,64], index: 1, kind: input, shape index: {}]   ;;  %s2157_s2 = inlined_call_operand.vmem [shape: bf16[16,144], index: 2, kind: input, shape index: {}]   ;;  %s2158_s3 = inlined_call_operand.vmem [shape: f32[16,1], index: 3, kind: input, shape index: {}]   ;;  %s2159_s4 = inlined_call_operand.vmem [shape: f32[16,1], index: 4, kind: input, shape index: {}]   ;;  %s2160_s5 = inlined_call_operand.vmem [shape: bf16[16,144], index: 5, kind: input, shape index: {}]   ;;  %s2161_s6 = inlined_call_operand.vmem [shape: f32[16,1], index: 6, kind: input, shape index: {}]   ;;  %s2162_s7 = inlined_call_operand.vmem [shape: f32[16,1], index: 7, kind: input, shape index: {}]   ;;  %s2163_s8 = inlined_call_operand.hbm [shape: f32[2,16,256], index: 8, kind: output, shape index: {}]  }
   0x1   :  { %15 = vsyncpa [#allocation5 + $0x1], 0  ;;  %s1653_s27 = smov 0   ;;  %s1655_s28 = smov 0  }
   0x2   :  { %s1657_s29 = smov 0   ;;  %s1659_s30 = smov 0  }
   0x3   :  { %s1661_s9 = smov 0   ;;  %s1663_s10 = smov 0  }
   0x4 LB: > { %s1394_s11 = sadd.s32 4294967295, %s1587_s10   ;;  %s1395_s12 = sadd.s32 4294967294, %s1587_s10   ;;  %s1587_s10 = sphi %s1663_s10, %s21_s10   ;;  %s1583_s9 = sphi %s1661_s9, %s2215_s9   ;;  %s1579_s30 = sphi %s1659_s30, %s2214_s30   ;;  %s1575_s29 = sphi %s1657_s29, %s2213_s29   ;;  %s1571_s28 = sphi %s1655_s28, %s2212_s28   ;;  %s1567_s27 = sphi %s1653_s27, %s2211_s27  }
   0x5   : > { %s33_s13 = sadd.s32 1, %s1583_s9  ;;  %s224_s14 = sadd.s32 1, %s1575_s29 }
   0x6   : > { %p35_p0 = scmp.ge.s32.totalorder %s33_s13, 2  ;;  %p234_p1 = scmp.ne.s32.totalorder %s1575_s29, %s1571_s28 }
   0x7   : > { %p235_p2 = scmp.eq.s32.totalorder %s1394_s11, 1  ;;  %p240_p3 = scmp.ne.s32.totalorder %s1571_s28, %s1567_s27 }
   0x8   : > { %s2217_s13 = smov (%p35_p0, %s33_s13), 0  ;;  %p241_p5 = scmp.eq.s32.totalorder %s1395_s12, 1 }
   0x9   : > { %p1693_p4 = por %p235_p2, %p234_p1  ;;  %s219_s16 = ssub.s32 %s1583_s9, %s2217_s13 }
   0xa   : > { %p1398_p6 = scmp.ge.s32.totalorder %s1587_s10, 1  ;;  %p222_p7 = scmp.eq.s32.totalorder %s219_s16, 0 }
   0xb   : > { %p1700_p8 = por %p241_p5, %p240_p3  ;;  %p300_p9 = scmp.lt.s32.totalorder %s1587_s10, 3 }
   0xc   : > { %s1706_s18 = scalar_select %p222_p7, %s1575_s29, %s224_s14  }
   0xd   : > { %p301_p10 = pnand %p1398_p6, %p300_p9 }
   0xe   : > { %p345_p11 = scmp.lt.s32.totalorder (!%p301_p10), %s1579_s30, 1  ;;  %v403_v0 = vlaneseq (!%p301_p10)  ;;  %v1589_v1 = vmov (!%p301_p10), 0   ;;  %s2172_s12 = smov (!%p301_p10), 96   ;;  %vm375_vm10 = vcmask (!%p301_p10), 1048320   ;;  %vm401_vm11 = vcmask (!%p301_p10), 261120  }
   0xf   : > { %304 = sbr.rel (%p301_p10) target bundleno = 1198 (0x4ae), region = 52  ;;  %863 = vmatprep.subr.bf16.mxu1 (!%p301_p10), %v1589_v1  ;;  %1497 = vset.pattern.permute.xlu1 (!%p301_p10), %v1589_v1  ;;  %s1591_s14 = smov (!%p301_p10), 97   ;;  %vm518_vm12 = vcmask (!%p301_p10), 793600   ;;  %vm535_vm15 = vcmask (!%p301_p10), 908288  }
  0x10   : > { %v404_v2 = vand.u32 (!%p301_p10), 127, %v403_v0  ;;  %v463_v3 = vshrl.u32 (!%p301_p10), %v403_v0, 7  ;;  %1496 = vset.pattern.permute.xlu0 (!%p301_p10), %v1589_v1  ;;  %s1592_s16 = smov (!%p301_p10), 111   ;;  %s2168_s22 = smov (!%p301_p10), 95  }
  0x11   : > { %s1597_s23 = smov (!%p301_p10), 126   ;;  %s1599_s25 = smov (!%p301_p10), 110  }
  0x12   : > { %v405_v4 = vadd.s32 (!%p301_p10), 128, %v404_v2  ;;  %v411_v5 = vand.u32 (!%p301_p10), 15, %v404_v2  ;;  %v464_v6 = vsub.s32 (!%p301_p10), 0, %v463_v3  ;;  %v406_v7 = vadd.s32 (!%p301_p10), 256, %v404_v2  ;;  %s2166_s26 = smov (!%p301_p10), 94  }
  0x13   : > { %v468_v14 = vsub.s32 (!%p301_p10), 4, %v463_v3 }
  0x14   : > { %v418_v9 = vand.u32 (!%p301_p10), 15, %v405_v4  ;;  %vm446_vm0 = vcmp.lt.s32.totalorder (!%p301_p10), %v411_v5, 15  ;;  %v425_v11 = vand.u32 (!%p301_p10), 15, %v406_v7  ;;  %vm443_vm4 = vcmp.gt.s32.totalorder (!%p301_p10), %v411_v5, 0 }
  0x16   : > { %s346_s19 = scalar_select %p345_p11, %s1579_s30, 1  ;;  %vm447_vm1 = vcmp.lt.s32.totalorder %v418_v9, 15  ;;  %vm448_vm3 = vcmp.lt.s32.totalorder %v425_v11, 15  ;;  %vm444_vm5 = vcmp.gt.s32.totalorder %v418_v9, 0  ;;  %vm445_vm8 = vcmp.gt.s32.totalorder %v425_v11, 0 }
  0x17   : > { %vm496_vm2 = vmpackc.low %vm447_vm1, %vm446_vm0 }
  0x18   : > { %s1421_s20 = sshll.u32 %s346_s19, 3  ;;  %s1420_s21 = sshll.u32 %s346_s19, 4  ;;  %v498_v15 = vsel %vm496_vm2, 65537, %v1589_v1  ;;  %vm497_vm6 = vmpackc.low %vm448_vm3, %vm448_vm3  ;;  %vm552_vm2 = vcmask 924672  }
  0x19   : > { %s359_s24 = scalar_lea.vmem %s2156_s1, %s1421_s20  ;;  %s352_s11 = scalar_lea.vmem %s2155_s0, %s1420_s21  ;;  %v1725_v16 = vrot.slane %v498_v15, %v464_v6  ;;  %v499_v17 = vsel %vm497_vm6, 65537, %v1589_v1  ;;  %vm458_vm7 = vmpackc.low %vm444_vm5, %vm443_vm4  ;;  %v1730_v19 = vrot.slane %v498_v15, %v468_v14  ;;  %vm569_vm5 = vcmask 1039360  }
  0x1a   : > { %v1498_v8 = vld [vmem:[%s359_s24] sm:$0xff]   ;;  %v511_v18 = vrot.slane %v499_v17, %v464_v6  ;;  %v460_v20 = vsel %vm458_vm7, 65537, %v1589_v1  ;;  %vm459_vm9 = vmpackc.low %vm445_vm8, %vm445_vm8  ;;  %s1593_s19 = smov 113   ;;  %s2170_s20 = smov 127  }
  0x1b   : > { %v1719_v10 = vld [vmem:[%s352_s11] ss:$8 sps:$4 sm:$0xff]   ;;  %372 = vrot.lane.b32.xlu0 %v1498_v8, %s2172_s12  ;;  %v1722_v12 = vld [vmem:[%s352_s11 + $0x4] ss:$8 sps:$4 sm:$0xff]   ;;  %512 = vrot.lane.b32.xlu1 %v1725_v16, %s1591_s14  ;;  %v1733_v21 = vrot.slane %v460_v20, %v468_v14  ;;  %v1736_v22 = vrot.slane %v460_v20, %v464_v6  ;;  %v461_v23 = vsel %vm459_vm9, 65537, %v1589_v1  ;;  %s2164_s21 = smov 1  }
  0x1c   : > { %v1502_v13 = vld [vmem:[%s359_s24] sm:$0xff]   ;;  %v473_v24 = vrot.slane %v461_v23, %v464_v6  ;;  %s1598_s24 = smov 112   ;;  %s1601_s11 = smov 33  }
  0x1f   : > { %398 = vrot.lane.b32.xlu0 %v1502_v13, %s2172_s12  ;;  %514 = vrot.lane.b32.xlu1 %v1730_v19, %s1591_s14 }
  0x23   : > { %516 = vrot.lane.b32.xlu0 %v511_v18, %s1591_s14  ;;  %529 = vrot.lane.b32.xlu1 %v1736_v22, %s1592_s16 }
  0x27   : > { %531 = vrot.lane.b32.xlu0 %v1733_v21, %s1592_s16  ;;  %533 = vrot.lane.b32.xlu1 %v473_v24, %s1592_s16 }
  0x2b   : > { %546 = vrot.lane.b32.xlu0 %v1725_v16, %s1593_s19  ;;  %548 = vrot.lane.b32.xlu1 %v1730_v19, %s1593_s19 }
  0x2f   : > { %550 = vrot.lane.b32.xlu0 %v511_v18, %s1593_s19  ;;  %563 = vrot.lane.b32.xlu1 %v1736_v22, %s2170_s20 }
  0x33   : > { %565 = vrot.lane.b32.xlu0 %v1733_v21, %s2170_s20  ;;  %567 = vrot.lane.b32.xlu1 %v473_v24, %s2170_s20 }
  0x37   : > { %580 = vrot.lane.b32.xlu0 %v1725_v16, %s2164_s21  ;;  %582 = vrot.lane.b32.xlu1 %v1730_v19, %s2164_s21 }
  0x3b   : > { %584 = vrot.lane.b32.xlu0 %v511_v18, %s2164_s21  ;;  %474 = vrot.lane.b32.xlu1 %v1736_v22, %s2168_s22  ;;  %s1603_s21 = smov 17  }
  0x3f   : > { %476 = vrot.lane.b32.xlu0 %v1733_v21, %s2168_s22  ;;  %478 = vrot.lane.b32.xlu1 %v473_v24, %s2168_s22 }
  0x43   : > { %600 = vrot.lane.b32.xlu0 %v1719_v10, %s2170_s20  ;;  %602 = vrot.lane.b32.xlu1 %v1722_v12, %s2170_s20 }
  0x47   : > { %643 = vrot.lane.b32.xlu0 %v1722_v12, %s1592_s16  ;;  %641 = vrot.lane.b32.xlu1 %v1719_v10, %s1592_s16 }
  0x8d   : > { %v373_v25 = vpop.permute.xlu0 %372  ;;  %v1769_v27 = vpop.permute.xlu1 %512 }
  0x8e   : > { %376 = vst.msk [vmem:[#allocation2] sm:$0xff] %vm375_vm10, %v373_v25  ;;  %vm521_vm10 = vcmp.ne.s16.totalorder %v1769_v27, 0 }
  0x91   : > { %v399_v26 = vpop.permute.xlu0 %398  ;;  %v515_v29 = vpop.permute.xlu1 %514 }
  0x92   : > { %402 = vst.msk [vmem:[#allocation2 + $0x18] sm:$0xff] %vm401_vm11, %v399_v26  ;;  %v519_v31 = vsel %vm518_vm12, %v1769_v27, %v515_v29 }
  0x93   : > { %vm522_vm14 = vcmp.ne.s16.totalorder %v519_v31, 0 }
  0x94   : > { %v526_v34 = vsel %vm522_vm14, %v1719_v10, 0 }
  0x95   : > { %v517_v28 = vpop.permute.xlu0 %516  ;;  %v530_v35 = vpop.permute.xlu1 %529  ;;  %612 = vrot.lane.b32.xlu1 %v526_v34, %s1597_s23  ;;  %v1809_v56 = vld [vmem:[#allocation2] sm:$0xff] }
  0x96   : > { %v520_v30 = vsel %vm518_vm12, %v515_v29, %v517_v28  ;;  %vm524_vm8 = vcmp.ne.s16.totalorder %v517_v28, 0  ;;  %v525_v60 = vsel %vm521_vm10, %v1809_v56, 0  ;;  %vm538_vm12 = vcmp.ne.s16.totalorder %v530_v35, 0 }
  0x97   : > { %vm523_vm13 = vcmp.ne.s16.totalorder %v520_v30, 0  ;;  %v542_v61 = vsel %vm538_vm12, %v1809_v56, 0 }
  0x98   : > { %v527_v33 = vsel %vm523_vm13, %v1722_v12, 0 }
  0x99   : > { %v532_v32 = vpop.permute.xlu0 %531  ;;  %614 = vrot.lane.b32.xlu0 %v527_v33, %s1597_s23  ;;  %v534_v39 = vpop.permute.xlu1 %533  ;;  %v489_v55 = vld [vmem:[#allocation2 + $0x18] sm:$0xff] }
  0x9a   : > { %v536_v36 = vsel %vm535_vm15, %v530_v35, %v532_v32  ;;  %v537_v40 = vsel %vm535_vm15, %v532_v32, %v534_v39  ;;  %v528_v57 = vsel %vm524_vm8, %v489_v55, 0  ;;  %vm541_vm9 = vcmp.ne.s16.totalorder %v534_v39, 0 }
  0x9b   : > { %vm539_vm0 = vcmp.ne.s16.totalorder %v536_v36, 0  ;;  %vm540_vm1 = vcmp.ne.s16.totalorder %v537_v40, 0  ;;  %v545_v58 = vsel %vm541_vm9, %v489_v55, 0 }
  0x9c   : > { %v543_v38 = vsel %vm539_vm0, %v1719_v10, 0  ;;  %v544_v42 = vsel %vm540_vm1, %v1722_v12, 0  ;;  %vm2175_vm0 = vcmask 7168  }
  0x9d   : > { %v1778_v37 = vpop.permute.xlu0 %546  ;;  %628 = vrot.lane.b32.xlu1 %v543_v38, %s1598_s24  ;;  %v549_v43 = vpop.permute.xlu1 %548  ;;  %630 = vrot.lane.b32.xlu0 %v544_v42, %s1598_s24 }
  0x9e   : > { %v553_v45 = vsel %vm552_vm2, %v1778_v37, %v549_v43  ;;  %vm555_vm1 = vcmp.ne.s16.totalorder %v1778_v37, 0 }
  0x9f   : > { %vm556_vm4 = vcmp.ne.s16.totalorder %v553_v45, 0  ;;  %v559_v6 = vsel %vm555_vm1, %v1809_v56, 0  ;;  %vm662_vm1 = vcmask 900096  }
  0xa0   : > { %v560_v48 = vsel %vm556_vm4, %v1719_v10, 0 }
  0xa1   : > { %v551_v41 = vpop.permute.xlu0 %550  ;;  %v1790_v49 = vpop.permute.xlu1 %563  ;;  %656 = vrot.lane.b32.xlu1 %v560_v48, %s1599_s25 }
  0xa2   : > { %v554_v44 = vsel %vm552_vm2, %v549_v43, %v551_v41  ;;  %vm558_vm13 = vcmp.ne.s16.totalorder %v551_v41, 0  ;;  %vm2178_vm2 = vcmask 777216   ;;  %vm572_vm4 = vcmp.ne.s16.totalorder %v1790_v49, 0 }
  0xa3   : > { %vm557_vm3 = vcmp.ne.s16.totalorder %v554_v44, 0  ;;  %v562_v62 = vsel %vm558_vm13, %v489_v55, 0  ;;  %v576_v9 = vsel %vm572_vm4, %v1809_v56, 0  ;;  %vm618_vm13 = vcmask 1031168  }
  0xa4   : > { %v561_v47 = vsel %vm557_vm3, %v1722_v12, 0 }
  0xa5   : > { %v1786_v46 = vpop.permute.xlu0 %565  ;;  %658 = vrot.lane.b32.xlu0 %v561_v47, %s1599_s25  ;;  %v568_v52 = vpop.permute.xlu1 %567 }
  0xa6   : > { %v1797_v50 = vsel %vm569_vm5, %v1790_v49, %v1786_v46  ;;  %v571_v53 = vsel %vm569_vm5, %v1786_v46, %v568_v52  ;;  %vm575_vm14 = vcmp.ne.s16.totalorder %v568_v52, 0 }
  0xa7   : > { %vm573_vm6 = vcmp.ne.s16.totalorder %v1797_v50, 0  ;;  %vm574_vm7 = vcmp.ne.s16.totalorder %v571_v53, 0  ;;  %v579_v2 = vsel %vm575_vm14, %v489_v55, 0  ;;  %vm634_vm14 = vcmask 916480  }
  0xa8   : > { %v577_v51 = vsel %vm573_vm6, %v1719_v10, 0  ;;  %v578_v54 = vsel %vm574_vm7, %v1722_v12, 0 }
  0xa9   : > { %672 = vrot.lane.b32.xlu1 %v577_v51, %s2172_s12  ;;  %674 = vrot.lane.b32.xlu0 %v578_v54, %s2172_s12  ;;  %v1817_v59 = vpop.permute.xlu0 %580  ;;  %v1825_v63 = vpop.permute.xlu1 %582 }
  0xaa   : > { %v1832_v3 = vsel %vm2175_vm0, %v1817_v59, %v1825_v63  ;;  %vm589_vm7 = vcmp.ne.s16.totalorder %v1817_v59, 0 }
  0xab   : > { %vm590_vm3 = vcmp.ne.s16.totalorder %v1832_v3, 0  ;;  %v592_v14 = vsel %vm589_vm7, %v1719_v10, 0 }
  0xac   : > { %v593_v8 = vsel %vm590_vm3, %v1722_v12, 0 }
  0xad   : > { %645 = vrot.lane.b32.xlu1 %v489_v55, %s1592_s16  ;;  %598 = vrot.lane.b32.xlu0 %v1809_v56, %s2170_s20  ;;  %v585_v0 = vpop.permute.xlu0 %584  ;;  %v475_v5 = vpop.permute.xlu1 %474  ;;  %s1604_s20 = smov 31  }
  0xae   : > { %v588_v13 = vsel %vm2175_vm0, %v1825_v63, %v585_v0  ;;  %vm483_vm12 = vcmp.ne.s16.totalorder %v475_v5, 0 }
  0xaf   : > { %vm591_vm9 = vcmp.ne.s16.totalorder %v588_v13, 0  ;;  %v486_v26 = vsel %vm483_vm12, %v1809_v56, 0  ;;  %vm770_vm12 = vcmask 269312  }
  0xb0   : > { %v594_v23 = vsel %vm591_vm9, %v489_v55, 0  ;;  %vm2177_vm9 = vcmask 130048  }
  0xb1   : > { %616 = vrot.lane.b32.xlu1 %v528_v57, %s1597_s23  ;;  %639 = vrot.lane.b32.xlu0 %v1809_v56, %s1592_s16  ;;  %v477_v4 = vpop.permute.xlu0 %476  ;;  %v479_v11 = vpop.permute.xlu1 %478 }
  0xb2   : > { %v481_v7 = vsel %vm2178_vm2, %v475_v5, %v477_v4  ;;  %v482_v17 = vsel %vm2178_vm2, %v477_v4, %v479_v11 }
  0xb3   : > { %vm484_vm8 = vcmp.ne.s16.totalorder %v481_v7, 0  ;;  %vm485_vm10 = vcmp.ne.s16.totalorder %v482_v17, 0 }
  0xb4   : > { %v487_v15 = vsel %vm484_vm8, %v1719_v10, 0  ;;  %v488_v24 = vsel %vm485_vm10, %v1722_v12, 0  ;;  %vm2176_vm8 = vcmask 785408   ;;  %vm2174_vm10 = vcmask 769024  }
  0xb5   : > { %632 = vrot.lane.b32.xlu1 %v545_v58, %s1598_s24  ;;  %610 = vrot.lane.b32.xlu0 %v525_v60, %s1597_s23  ;;  %v601_v18 = vpop.permute.xlu0 %600  ;;  %v603_v20 = vpop.permute.xlu1 %602 }
  0xb6   : > { %v605_v28 = vsel %vm569_vm5, %v601_v18, %v603_v20 }
  0xb9   : > { %682 = vrot.lane.b32.xlu1 %v1719_v10, %s2168_s22  ;;  %626 = vrot.lane.b32.xlu0 %v542_v61, %s1598_s24  ;;  %v642_v10 = vpop.permute.xlu1 %641  ;;  %v644_v25 = vpop.permute.xlu0 %643 }
  0xba   : > { %v648_v27 = vsel %vm535_vm15, %v642_v10, %v644_v25 }
  0xbd   : > { %660 = vrot.lane.b32.xlu1 %v562_v62, %s1599_s25  ;;  %684 = vrot.lane.b32.xlu0 %v1722_v12, %s2168_s22 }
  0xc1   : > { %676 = vrot.lane.b32.xlu1 %v579_v2, %s2172_s12  ;;  %654 = vrot.lane.b32.xlu0 %v559_v6, %s1599_s25  ;;  %v1505_v6 = vld [vmem:[%s2157_s2 + $0x4] ss:$8 sps:$4 sm:$0xff]  }
  0xc2   : > { %1411 = vmatprep.mubr.msk.bf16.mxu1 %vm2177_vm9, %v1505_v6  ;;  %1410 = vmatprep.mubr.msk.bf16.mxu0 %vm2177_vm9, %v1505_v6 }
  0xc5   : > { %686 = vrot.lane.b32.xlu1 %v489_v55, %s2168_s22  ;;  %670 = vrot.lane.b32.xlu0 %v576_v9, %s2172_s12  ;;  %s1602_s12 = smov 15  }
  0xc9   : > { %695 = vrot.lane.b32.xlu1 %v593_v8, %s2166_s26  ;;  %693 = vrot.lane.b32.xlu0 %v592_v14, %s2166_s26 }
  0xcd   : > { %718 = vrot.lane.b32.xlu1 %v487_v15, %s1601_s11  ;;  %697 = vrot.lane.b32.xlu0 %v594_v23, %s2166_s26  ;;  %s2181_s26 = smov 96  }
  0xd1   : > { %726 = vrot.lane.b32.xlu1 %v603_v20, %s1601_s11  ;;  %720 = vrot.lane.b32.xlu0 %v488_v24, %s1601_s11 }
  0xd5   : > { %716 = vrot.lane.b32.xlu1 %v486_v26, %s1601_s11  ;;  %724 = vrot.lane.b32.xlu0 %v605_v28, %s1601_s11 }
  0xd9   : > { %742 = vrot.lane.b32.xlu1 %v648_v27, %s1601_s11  ;;  %v904_v27 = vld [vmem:[%s2158_s3] sm:$0xff] }
 0x107   : > { %v613_v30 = vpop.permute.xlu1 %612 }
 0x10b   : > { %v615_v29 = vpop.permute.xlu0 %614 }
 0x10c   : > { %v620_v12 = vsel %vm618_vm13, %v613_v30, %v615_v29 }
 0x10d   : > { %730 = vrot.lane.b32.xlu1 %v620_v12, %s1601_s11  ;;  %v923_v12 = vld [vmem:[%s2159_s4 + $0x8] sm:$0xff] }
 0x10f   : > { %v629_v31 = vpop.permute.xlu1 %628  ;;  %v631_v32 = vpop.permute.xlu0 %630 }
 0x110   : > { %v636_v33 = vsel %vm634_vm14, %v629_v31, %v631_v32 }
 0x111   : > { %736 = vrot.lane.b32.xlu0 %v636_v33, %s1601_s11 }
 0x113   : > { %v657_v35 = vpop.permute.xlu1 %656 }
 0x117   : > { %v659_v34 = vpop.permute.xlu0 %658 }
 0x118   : > { %v664_v36 = vsel %vm662_vm1, %v657_v35, %v659_v34 }
 0x119   : > { %748 = vrot.lane.b32.xlu0 %v664_v36, %s1601_s11 }
 0x11b   : > { %v673_v37 = vpop.permute.xlu1 %672  ;;  %v675_v38 = vpop.permute.xlu0 %674 }
 0x11c   : > { %v680_v62 = vsel %vm2176_vm8, %v673_v37, %v675_v38 }
 0x11f   : > { %v646_v39 = vpop.permute.xlu1 %645  ;;  %v599_v40 = vpop.permute.xlu0 %598 }
 0x120   : > { %v604_v42 = vsel %vm569_vm5, %v599_v40, %v601_v18  ;;  %v649_v45 = vsel %vm535_vm15, %v644_v25, %v646_v39 }
 0x121   : > { %722 = vrot.lane.b32.xlu0 %v604_v42, %s1601_s11 }
 0x123   : > { %v617_v41 = vpop.permute.xlu1 %616  ;;  %v640_v43 = vpop.permute.xlu0 %639 }
 0x124   : > { %v647_v47 = vsel %vm535_vm15, %v640_v43, %v642_v10  ;;  %v621_v52 = vsel %vm618_vm13, %v615_v29, %v617_v41  ;;  %v905_v29 = vld [vmem:[%s2158_s3 + $0x8] sm:$0xff] }
 0x125   : > { %744 = vrot.lane.b32.xlu0 %v649_v45, %s1601_s11  ;;  %740 = vrot.lane.b32.xlu1 %v647_v47, %s1601_s11 }
 0x127   : > { %v633_v44 = vpop.permute.xlu1 %632  ;;  %v611_v48 = vpop.permute.xlu0 %610 }
 0x128   : > { %v619_v53 = vsel %vm618_vm13, %v611_v48, %v613_v30  ;;  %v637_v57 = vsel %vm634_vm14, %v631_v32, %v633_v44 }
 0x129   : > { %732 = vrot.lane.b32.xlu0 %v621_v52, %s1601_s11  ;;  %728 = vrot.lane.b32.xlu1 %v619_v53, %s1601_s11 }
 0x12b   : > { %v683_v51 = vpop.permute.xlu1 %682  ;;  %v627_v54 = vpop.permute.xlu0 %626 }
 0x12c   : > { %v635_v56 = vsel %vm634_vm14, %v627_v54, %v629_v31  ;;  %v922_v31 = vld [vmem:[%s2159_s4] sm:$0xff] }
 0x12d   : > { %734 = vrot.lane.b32.xlu0 %v635_v56, %s1601_s11  ;;  %738 = vrot.lane.b32.xlu1 %v637_v57, %s1601_s11 }
 0x12f   : > { %v661_v55 = vpop.permute.xlu1 %660  ;;  %v685_v58 = vpop.permute.xlu0 %684 }
 0x130   : > { %v688_v61 = vsel %vm2178_vm2, %v683_v51, %v685_v58  ;;  %v665_v5 = vsel %vm662_vm1, %v659_v34, %v661_v55 }
 0x131   : > { %760 = vrot.lane.b32.xlu0 %v688_v61, %s1601_s11  ;;  %754 = vrot.lane.b32.xlu1 %v680_v62, %s1601_s11 }
 0x133   : > { %v677_v60 = vpop.permute.xlu1 %676  ;;  %v655_v0 = vpop.permute.xlu0 %654 }
 0x134   : > { %v663_v4 = vsel %vm662_vm1, %v655_v0, %v657_v35  ;;  %v681_v9 = vsel %vm2176_vm8, %v675_v38, %v677_v60 }
 0x135   : > { %746 = vrot.lane.b32.xlu0 %v663_v4, %s1601_s11  ;;  %750 = vrot.lane.b32.xlu1 %v665_v5, %s1601_s11  ;;  %v1503_v4 = vld [vmem:[%s2157_s2] ss:$8 sps:$4 sm:$0xff]  }
 0x137   : > { %v687_v2 = vpop.permute.xlu1 %686  ;;  %v671_v7 = vpop.permute.xlu0 %670 }
 0x138   : > { %v689_v11 = vsel %vm2178_vm2, %v685_v58, %v687_v2  ;;  %v679_v15 = vsel %vm2176_vm8, %v671_v7, %v673_v37  ;;  %vm999_vm2 = vcmask 252928  }
 0x139   : > { %756 = vrot.lane.b32.xlu0 %v681_v9, %s1601_s11  ;;  %762 = vrot.lane.b32.xlu1 %v689_v11, %s1601_s11 }
 0x13b   : > { %v696_v8 = vpop.permute.xlu1 %695  ;;  %v694_v13 = vpop.permute.xlu0 %693 }
 0x13c   : > { %v700_v23 = vsel %vm2174_vm10, %v694_v13, %v696_v8 }
 0x13d   : > { %758 = vrot.lane.b32.xlu0 %v683_v51, %s1601_s11  ;;  %752 = vrot.lane.b32.xlu1 %v679_v15, %s1601_s11 }
 0x13f   : > { %v719_v14 = vpop.permute.xlu1 %718  ;;  %v698_v17 = vpop.permute.xlu0 %697 }
 0x140   : > { %v701_v20 = vsel %vm2174_vm10, %v696_v8, %v698_v17  ;;  %vm957_vm10 = vcmask 261248  }
 0x141   : > { %768 = vrot.lane.b32.xlu0 %v701_v20, %s1601_s11  ;;  %766 = vrot.lane.b32.xlu1 %v700_v23, %s1601_s11 }
 0x143   : > { %v727_v18 = vpop.permute.xlu1 %726  ;;  %v721_v24 = vpop.permute.xlu0 %720 }
 0x144   : > { %v772_v25 = vsel %vm770_vm12, %v719_v14, %v721_v24  ;;  %864 = vmatpush1.bf16.msra.mxu1 %v721_v24 }
 0x145   : > { %764 = vrot.lane.b32.xlu1 %v694_v13, %s1601_s11  ;;  %820 = vmatprep.subr.bf16.mxu0 %v772_v25 }
 0x146   : > { %865 = vmatprep.subr.bf16.mxu1 %v1589_v1  ;;  %908 = vperm.xlu0 %1496, %v904_v27  }
 0x147   : > { %v717_v10 = vpop.permute.xlu1 %716  ;;  %v725_v28 = vpop.permute.xlu0 %724 }
 0x148   : > { %v771_v26 = vsel %vm770_vm12, %v717_v10, %v719_v14  ;;  %v774_v30 = vsel %vm770_vm12, %v725_v28, %v727_v18  ;;  %866 = vmatpush1.bf16.msra.mxu1 %v727_v18 }
 0x149   : > { %821 = vmatpush1.bf16.msra.mxu0 %v771_v26  ;;  %867 = vmatprep.subr.bf16.mxu1 %v1589_v1 }
 0x14a   : > { %822 = vmatprep.subr.bf16.mxu0 %v774_v30  ;;  %913 = vperm.xlu1 %1497, %v905_v29  }
 0x14b   : > { %931 = vperm.xlu0 %1496, %v923_v12   ;;  %v743_v33 = vpop.permute.xlu1 %742 }
 0x14e   : > { %926 = vperm.xlu1 %1497, %v922_v31  }
 0x14f   : > { %973 = vrot.lane.b32.xlu0 %v1733_v21, %s1602_s12 }
 0x152   : > { %971 = vrot.lane.b32.xlu1 %v1736_v22, %s1602_s12 }
 0x153   : > { %985 = vrot.lane.b32.xlu0 %v1730_v19, %s1603_s21 }
 0x156   : > { %983 = vrot.lane.b32.xlu1 %v1725_v16, %s1603_s21 }
 0x157   : > { %997 = vrot.lane.b32.xlu0 %v1733_v21, %s1604_s20 }
 0x15a   : > { %995 = vrot.lane.b32.xlu1 %v1736_v22, %s1604_s20  ;;  %s1422_s20 = sshll.u32 %s1579_s30, 9 }
 0x15b   : > { %1009 = vrot.lane.b32.xlu0 %v1730_v19, %s1601_s11 }
 0x15e   : > { %1007 = vrot.lane.b32.xlu1 %v1725_v16, %s1601_s11  ;;  %s2182_s11 = smov 127  }
 0x17f   : > { %v731_v35 = vpop.permute.xlu1 %730 }
 0x183   : > { %v737_v32 = vpop.permute.xlu0 %736 }
 0x18b   : > { %v749_v34 = vpop.permute.xlu0 %748 }
 0x193   : > { %v723_v36 = vpop.permute.xlu0 %722 }
 0x194   : > { %v773_v37 = vsel %vm770_vm12, %v723_v36, %v725_v28 }
 0x195   : > { %823 = vmatpush1.bf16.msra.mxu0 %v773_v37 }
 0x197   : > { %v745_v38 = vpop.permute.xlu0 %744  ;;  %v741_v39 = vpop.permute.xlu1 %740 }
 0x198   : > { %v780_v44 = vsel %vm770_vm12, %v743_v33, %v745_v38  ;;  %v779_v48 = vsel %vm770_vm12, %v741_v39, %v743_v33 }
 0x19b   : > { %v733_v40 = vpop.permute.xlu0 %732  ;;  %v729_v21 = vpop.permute.xlu1 %728 }
 0x19c   : > { %868 = vmatpush1.bf16.msra.mxu1 %v733_v40  ;;  %v776_v22 = vsel %vm770_vm12, %v731_v35, %v733_v40  ;;  %v775_v19 = vsel %vm770_vm12, %v729_v21, %v731_v35 }
 0x19d   : > { %824 = vmatprep.subr.bf16.mxu0 %v776_v22  ;;  %869 = vmatprep.subr.bf16.mxu1 %v1589_v1 }
 0x19e   : > { %825 = vmatpush1.bf16.msra.mxu0 %v775_v19 }
 0x19f   : > { %v735_v16 = vpop.permute.xlu0 %734  ;;  %v739_v41 = vpop.permute.xlu1 %738 }
 0x1a0   : > { %870 = vmatpush1.bf16.msra.mxu1 %v739_v41  ;;  %v778_v42 = vsel %vm770_vm12, %v737_v32, %v739_v41  ;;  %v777_v43 = vsel %vm770_vm12, %v735_v16, %v737_v32 }
 0x1a1   : > { %826 = vmatprep.subr.bf16.mxu0 %v778_v42  ;;  %871 = vmatprep.subr.bf16.mxu1 %v1589_v1 }
 0x1a2   : > { %827 = vmatpush1.bf16.msra.mxu0 %v777_v43 }
 0x1a3   : > { %v761_v45 = vpop.permute.xlu0 %760  ;;  %828 = vmatprep.subr.bf16.mxu0 %v780_v44  ;;  %v755_v47 = vpop.permute.xlu1 %754 }
 0x1a4   : > { %872 = vmatpush1.bf16.msra.mxu1 %v745_v38 }
 0x1a5   : > { %873 = vmatprep.subr.bf16.mxu1 %v1589_v1 }
 0x1a6   : > { %829 = vmatpush1.bf16.msra.mxu0 %v779_v48 }
 0x1a7   : > { %v747_v51 = vpop.permute.xlu0 %746  ;;  %v751_v52 = vpop.permute.xlu1 %750 }
 0x1a8   : > { %874 = vmatpush1.bf16.msra.mxu1 %v751_v52  ;;  %v782_v53 = vsel %vm770_vm12, %v749_v34, %v751_v52  ;;  %v781_v54 = vsel %vm770_vm12, %v747_v51, %v749_v34 }
 0x1a9   : > { %830 = vmatprep.subr.bf16.mxu0 %v782_v53  ;;  %875 = vmatprep.subr.bf16.mxu1 %v1589_v1 }
 0x1aa   : > { %831 = vmatpush1.bf16.msra.mxu0 %v781_v54 }
 0x1ab   : > { %v757_v55 = vpop.permute.xlu0 %756  ;;  %v763_v56 = vpop.permute.xlu1 %762 }
 0x1ac   : > { %876 = vmatpush1.bf16.msra.mxu1 %v757_v55  ;;  %v784_v57 = vsel %vm770_vm12, %v755_v47, %v757_v55  ;;  %v786_v62 = vsel %vm770_vm12, %v761_v45, %v763_v56 }
 0x1ad   : > { %832 = vmatprep.subr.bf16.mxu0 %v784_v57  ;;  %877 = vmatprep.subr.bf16.mxu1 %v1589_v1 }
 0x1af   : > { %v759_v58 = vpop.permute.xlu0 %758  ;;  %v753_v60 = vpop.permute.xlu1 %752 }
 0x1b0   : > { %878 = vmatpush1.bf16.msra.mxu1 %v763_v56  ;;  %v783_v61 = vsel %vm770_vm12, %v753_v60, %v755_v47  ;;  %v785_v5 = vsel %vm770_vm12, %v759_v58, %v761_v45 }
 0x1b1   : > { %833 = vmatpush1.bf16.msra.mxu0 %v783_v61  ;;  %879 = vmatprep.subr.bf16.mxu1 %v1589_v1 }
 0x1b2   : > { %834 = vmatprep.subr.bf16.mxu0 %v786_v62 }
 0x1b3   : > { %v769_v0 = vpop.permute.xlu0 %768  ;;  %v767_v2 = vpop.permute.xlu1 %766 }
 0x1b4   : > { %880 = vmatpush1.bf16.msra.mxu1 %v769_v0  ;;  %v788_v6 = vsel %vm770_vm12, %v767_v2, %v769_v0 }
 0x1b5   : > { %835 = vmatpush1.bf16.msra.mxu0 %v785_v5 }
 0x1b6   : > { %836 = vmatprep.subr.bf16.mxu0 %v788_v6 }
 0x1b7   : > { %896 = vmatmul.mubr.bf16.vlgmr.msra.gmra.mrb[0].mxu1 %v1503_v4  ;;  %v765_v7 = vpop.permute.xlu1 %764 }
 0x1b8   : > { %v787_v8 = vsel %vm770_vm12, %v765_v7, %v767_v2 }
 0x1b9   : > { %837 = vmatpush1.bf16.msra.mxu0 %v787_v8 }
 0x1bc   : > { %853 = vmatmul.mubr.bf16.vlgmr.msra.gmra.mrb[0].mxu0 %v1503_v4 }
 0x1c5   : > { %v909_v11 = vpop.permute.xlu0 %908 }
 0x1c9   : > { %v914_v9 = vpop.permute.xlu1 %913 }
 0x1ca   : > { %v932_v20 = vpop.permute.xlu0 %931 }
 0x1cd   : > { %v927_v17 = vpop.permute.xlu1 %926 }
 0x1ce   : > { %v974_v38 = vpop.permute.xlu0 %973 }
 0x1cf   : > { %vm979_vm0 = vcmp.ne.s16.totalorder %v974_v38, 0 }
 0x1d1   : > { %v972_v53 = vpop.permute.xlu1 %971 }
 0x1d2   : > { %v986_v43 = vpop.permute.xlu0 %985 }
 0x1d3   : > { %vm991_vm8 = vcmp.ne.s16.totalorder %v986_v43, 0 }
 0x1d5   : > { %v984_v56 = vpop.permute.xlu1 %983 }
 0x1d6   : > { %v998_v47 = vpop.permute.xlu0 %997 }
 0x1d9   : > { %v996_v60 = vpop.permute.xlu1 %995 }
 0x1da   : > { %v1000_v62 = vsel %vm999_vm2, %v996_v60, %v998_v47  ;;  %v1010_v0 = vpop.permute.xlu0 %1009 }
 0x1dd   : > { %v1008_v2 = vpop.permute.xlu1 %1007 }
 0x1de   : > { %v1011_v6 = vsel %vm770_vm12, %v1008_v2, %v1010_v0  ;;  %vm1012_vm2 = vcmp.ne.s16.totalorder %v1008_v2, 0  ;;  %vm962_vm12 = vcmp.ne.s16.totalorder %v1786_v46, 0 }
 0x28a   : > { %v897_v13 = vpop.f32.mrb[0].mxu1 }
 0x28b   : > { %v918_v14 = vmul.f32 %v909_v11, %v897_v13  ;;  %v899_v15 = vpop.f32.mrb[1].mxu1 }
 0x28c   : > { %v900_v18 = vpop.f32.mrb[2].mxu1 }
 0x28d   : > { %v936_v23 = vadd.f32 %v927_v17, %v918_v14  ;;  %v921_v24 = vmul.f32 %v914_v9, %v900_v18  ;;  %v902_v10 = vpop.f32.mrb[3].mxu1 }
 0x28f   : > { %v939_v25 = vadd.f32 %v932_v20, %v921_v24  ;;  %v854_v26 = vpop.f32.mrb[0].mxu0  ;;  %v942_v29 = vmax.f32 %v936_v23, 0.0 }
 0x290   : > { %v916_v27 = vmul.f32 %v909_v11, %v854_v26  ;;  %v856_v28 = vpop.f32.mrb[1].mxu0 }
 0x291   : > { %v945_v30 = vmax.f32 %v939_v25, 0.0  ;;  %v917_v12 = vmul.f32 %v909_v11, %v856_v28  ;;  %v858_v31 = vpop.f32.mrb[2].mxu0  ;;  %v959_v11 = vld [vmem:[#allocation3] sm:$0xff] }
 0x292   : > { %v934_v32 = vadd.f32 %v927_v17, %v916_v27  ;;  %v919_v33 = vmul.f32 %v914_v9, %v858_v31  ;;  %v860_v34 = vpop.f32.mrb[3].mxu0  ;;  %v963_v13 = vsel %vm572_vm4, %v959_v11, 0 }
 0x293   : > { %v948_v35 = vpack.c.bf16 %v945_v30, %v942_v29  ;;  %v935_v36 = vadd.f32 %v927_v17, %v917_v12  ;;  %v920_v37 = vmul.f32 %v914_v9, %v860_v34 }
 0x294   : > { %v937_v39 = vadd.f32 %v932_v20, %v919_v33  ;;  %v940_v21 = vmax.f32 %v934_v32, 0.0 }
 0x295   : > { %951 = vst.msk [vmem:[#allocation3 + $0x18] sm:$0xff] %vm401_vm11, %v948_v35  ;;  %v938_v40 = vadd.f32 %v932_v20, %v920_v37  ;;  %v941_v19 = vmax.f32 %v935_v36, 0.0  ;;  %vm1003_vm11 = vcmp.ne.s16.totalorder %v998_v47, 0  ;;  %v1506_v47 = vld [vmem:[%s2160_s5 + $0x4] ss:$8 sps:$4 sm:$0xff]  }
 0x296   : > { %958 = vst.msk [vmem:[#allocation3 + $0x18] sm:$0xff] %vm957_vm10, %v1589_v1  ;;  %v943_v22 = vmax.f32 %v937_v39, 0.0  ;;  %vm967_vm10 = vcmp.ne.s16.totalorder %v1825_v63, 0 }
 0x297   : > { %v944_v16 = vmax.f32 %v938_v40, 0.0 }
 0x298   : > { %v946_v41 = vpack.c.bf16 %v943_v22, %v940_v21 }
 0x299   : > { %v1970_v42 = vpack.c.bf16 %v944_v16, %v941_v19 }
 0x29a   : > { %949 = vst [vmem:[#allocation3 + $0x8] sm:$0xff] %v946_v41 }
 0x29b   : > { %956 = vst.msk [vmem:[#allocation3 + $0x8] sm:$0xff] %vm2177_vm9, %v1589_v1  ;;  %v969_v63 = vsel %vm590_vm3, %v1970_v42, 0  ;;  %vm989_vm9 = vcmp.ne.s16.totalorder %v984_v56, 0  ;;  %v965_v14 = vsel %vm962_vm12, %v1970_v42, 0 }
 0x29d   : > { %v966_v44 = vld [vmem:[#allocation3 + $0x18] sm:$0xff] }
 0x29e   : > { %1052 = vrot.lane.b32.xlu1 %v966_v44, %s1592_s16  ;;  %v982_v45 = vsel %vm979_vm0, %v966_v44, 0  ;;  %v994_v48 = vsel %vm991_vm8, %v966_v44, 0  ;;  %v970_v51 = vsel %vm967_vm10, %v966_v44, 0  ;;  %v1006_v52 = vsel %vm1003_vm11, %v966_v44, 0 }
 0x29f   : > { %1043 = vrot.lane.b32.xlu0 %v982_v45, %s1598_s24  ;;  %vm975_vm0 = vcmask 121856   ;;  %vm977_vm8 = vcmp.ne.s16.totalorder %v972_v53, 0  ;;  %vm987_vm10 = vcmask 138240  }
 0x2a0   : > { %v976_v54 = vsel %vm975_vm0, %v972_v53, %v974_v38  ;;  %v988_v3 = vsel %vm987_vm10, %v984_v56, %v986_v43  ;;  %vm1001_vm0 = vcmp.ne.s16.totalorder %v996_v60, 0  ;;  %v1248_v56 = vld [vmem:[%s2161_s6 + $0x8] sm:$0xff] }
 0x2a1   : > { %vm978_vm11 = vcmp.ne.s16.totalorder %v976_v54, 0  ;;  %vm990_vm3 = vcmp.ne.s16.totalorder %v988_v3, 0  ;;  %v1263_v3 = vld [vmem:[%s2162_s7] sm:$0xff] }
 0x2a2   : > { %1032 = vrot.lane.b32.xlu1 %v970_v51, %s1597_s23  ;;  %v960_v1 = vld [vmem:[#allocation3 + $0x8] sm:$0xff]  ;;  %v981_v58 = vsel %vm978_vm11, %v1970_v42, 0  ;;  %v993_v59 = vsel %vm990_vm3, %v1970_v42, 0  ;;  %vm2193_vm11 = vcmask 769024  }
 0x2a3   : > { %1063 = vrot.lane.b32.xlu0 %v994_v48, %s1599_s25  ;;  %v980_v55 = vsel %vm977_vm8, %v960_v1, 0  ;;  %v968_v57 = vsel %vm589_vm7, %v960_v1, 0  ;;  %v992_v61 = vsel %vm989_vm9, %v960_v1, 0  ;;  %vm1002_vm7 = vcmp.ne.s16.totalorder %v1000_v62, 0  ;;  %vm2194_vm10 = vmmov %vm2193_vm11 }
 0x2a4   : > { %v1005_v4 = vsel %vm1002_vm7, %v1970_v42, 0  ;;  %v1004_v5 = vsel %vm1001_vm0, %v960_v1, 0  ;;  %vm1013_vm9 = vcmp.ne.s16.totalorder %v1011_v6, 0  ;;  %v1015_v7 = vsel %vm1012_vm2, %v960_v1, 0 }
 0x2a5   : > { %vm1014_vm8 = vcmp.ne.s16.totalorder %v1010_v0, 0  ;;  %v1016_v8 = vsel %vm1013_vm9, %v1970_v42, 0  ;;  %v964_v15 = vsel %vm573_vm6, %v960_v1, 0 }
 0x2a6   : > { %1074 = vrot.lane.b32.xlu1 %v1006_v52, %s2181_s26  ;;  %v1017_v9 = vsel %vm1014_vm8, %v966_v44, 0 }
 0x2a7   : > { %1022 = vrot.lane.b32.xlu0 %v1970_v42, %s2182_s11 }
 0x2aa   : > { %1020 = vrot.lane.b32.xlu1 %v960_v1, %s2182_s11 }
 0x2ab   : > { %1050 = vrot.lane.b32.xlu0 %v1970_v42, %s1592_s16 }
 0x2ae   : > { %1048 = vrot.lane.b32.xlu1 %v960_v1, %s1592_s16  ;;  %s2183_s16 = smov 95  }
 0x2af   : > { %1030 = vrot.lane.b32.xlu0 %v969_v63, %s1597_s23 }
 0x2b2   : > { %1028 = vrot.lane.b32.xlu1 %v968_v57, %s1597_s23  ;;  %s2184_s23 = smov 94   ;;  %v1247_v57 = vld [vmem:[%s2161_s6] sm:$0xff] }
 0x2b3   : > { %1039 = vrot.lane.b32.xlu0 %v980_v55, %s1598_s24 }
 0x2b6   : > { %1041 = vrot.lane.b32.xlu1 %v981_v58, %s1598_s24  ;;  %s2185_s24 = smov 1   ;;  %v1264_v58 = vld [vmem:[%s2162_s7 + $0x8] sm:$0xff] }
 0x2b7   : > { %1078 = vrot.lane.b32.xlu0 %v960_v1, %s2183_s16 }
 0x2ba   : > { %1080 = vrot.lane.b32.xlu1 %v1970_v42, %s2183_s16 }
 0x2bb   : > { %1059 = vrot.lane.b32.xlu0 %v992_v61, %s1599_s25 }
 0x2be   : > { %1061 = vrot.lane.b32.xlu1 %v993_v59, %s1599_s25  ;;  %s341_s25 = sand.u32 1, %s1571_s28  }
 0x2bf   : > { %1072 = vrot.lane.b32.xlu0 %v1005_v4, %s2181_s26  ;;  %s1399_s14 = sshll.u32 %s341_s25, 5  ;;  %s2109_s30 = scalar_lea.sflag [#allocation5], %s341_s25 }
 0x2c0   : > { %s343_s19 = scalar_lea.vmem [#allocation4], %s1399_s14 }
 0x2c1   : > { %s1303_s21 = sshll.u32 %s343_s19, 4  ;;  %s2100_s21 = int_to_ptr.vmem [resolvable:$true] %s1303_s21 }
 0x2c2   : > { %1070 = vrot.lane.b32.xlu1 %v1004_v5, %s2181_s26  ;;  %s2105_s26 = scalar_lea.hbm %s2163_s8, %s1422_s20  ;;  %s1509_s11 = scalar_lea.vmem %s2100_s21, 512 }
 0x2c3   : > { %1082 = vrot.lane.b32.xlu0 %v966_v44, %s2183_s16  ;;  %p1510_p12 = scmp.ne.s32.totalorder %s2100_s21, %s1509_s11  ;;  %s1605_s16 = smov [#allocation4]  }
 0x2c5   : > { %p1511_p13 = pnand %p1510_p12, %p1693_p4 }
 0x2c6   : > { %1089 = vrot.lane.b32.xlu1 %v1015_v7, %s2184_s23 }
 0x2c7   : > { %1091 = vrot.lane.b32.xlu0 %v1016_v8, %s2184_s23  ;;  %p1512_p0 = pneg %p1511_p13 }
 0x2ca   : > { %1093 = vrot.lane.b32.xlu1 %v1017_v9, %s2184_s23  ;;  %s1513_s23 = sshll.u32 %s1605_s16, 4  ;;  %s1514_s23 = int_to_ptr.vmem [resolvable:$false] %s1513_s23 }
 0x2cb   : > { %1111 = vrot.lane.b32.xlu0 %v963_v13, %s2185_s24  ;;  %p1516_p1 = scmp.lt.s32.totalorder %s2100_s21, %s1514_s23 }
 0x2ce   : > { %1115 = vrot.lane.b32.xlu1 %v965_v14, %s2185_s24 }
 0x2cf   : > { %1113 = vrot.lane.b32.xlu0 %v964_v15, %s2185_s24 }
 0x310   : > { %v1053_v17 = vpop.permute.xlu1 %1052 }
 0x311   : > { %v1044_v18 = vpop.permute.xlu0 %1043 }
 0x314   : > { %v1033_v20 = vpop.permute.xlu1 %1032 }
 0x315   : > { %v1064_v23 = vpop.permute.xlu0 %1063 }
 0x318   : > { %v1075_v24 = vpop.permute.xlu1 %1074 }
 0x319   : > { %v1023_v49 = vpop.permute.xlu0 %1022 }
 0x31a   : > { %1121 = vrot.lane.b32.xlu0 %v1023_v49, %s2185_s24 }
 0x31c   : > { %v1021_v10 = vpop.permute.xlu1 %1020 }
 0x31d   : > { %v1051_v25 = vpop.permute.xlu0 %1050  ;;  %1117 = vrot.lane.b32.xlu1 %v1021_v10, %s2185_s24  ;;  %v1024_v46 = vsel %vm569_vm5, %v1021_v10, %v1023_v49  ;;  %vm2187_vm5 = vcmask 785408  }
 0x31e   : > { %v1055_v12 = vsel %vm535_vm15, %v1051_v25, %v1053_v17  ;;  %vm2189_vm4 = vmmov %vm2187_vm5 }
 0x320   : > { %v1049_v26 = vpop.permute.xlu1 %1048 }
 0x321   : > { %v1031_v27 = vpop.permute.xlu0 %1030  ;;  %1119 = vrot.lane.b32.xlu1 %v1024_v46, %s2185_s24  ;;  %1135 = vrot.lane.b32.xlu0 %v1049_v26, %s2185_s24  ;;  %v1054_v29 = vsel %vm535_vm15, %v1049_v26, %v1051_v25  ;;  %vm2186_vm15 = vcmask 777216  }
 0x322   : > { %v1035_v37 = vsel %vm618_vm13, %v1031_v27, %v1033_v20  ;;  %vm2188_vm6 = vmmov %vm2186_vm15 }
 0x324   : > { %v1029_v50 = vpop.permute.xlu1 %1028 }
 0x325   : > { %v1040_v28 = vpop.permute.xlu0 %1039  ;;  %1123 = vrot.lane.b32.xlu0 %v1029_v50, %s2185_s24  ;;  %v1034_v32 = vsel %vm618_vm13, %v1029_v50, %v1031_v27  ;;  %vm2190_vm13 = vcmask 130048  }
 0x326   : > { %1129 = vrot.lane.b32.xlu1 %v1040_v28, %s2185_s24  ;;  %1414 = vmatprep.mubr.msk.bf16.mxu0 %vm2190_vm13, %v1506_v47 }
 0x328   : > { %v1042_v30 = vpop.permute.xlu1 %1041 }
 0x329   : > { %v1079_v31 = vpop.permute.xlu0 %1078  ;;  %1137 = vrot.lane.b32.xlu0 %v1054_v29, %s2185_s24  ;;  %v1046_v35 = vsel %vm634_vm14, %v1042_v30, %v1044_v18  ;;  %v1045_v40 = vsel %vm634_vm14, %v1040_v28, %v1042_v30  ;;  %vm2191_vm14 = vcmask 7168  }
 0x32a   : > { %1139 = vrot.lane.b32.xlu1 %v1055_v12, %s2185_s24 }
 0x32c   : > { %v1081_v33 = vpop.permute.xlu1 %1080 }
 0x32d   : > { %v1060_v34 = vpop.permute.xlu0 %1059  ;;  %1125 = vrot.lane.b32.xlu0 %v1034_v32, %s2185_s24  ;;  %v1084_v16 = vsel %vm2186_vm15, %v1079_v31, %v1081_v33 }
 0x32e   : > { %1141 = vrot.lane.b32.xlu1 %v1060_v34, %s2185_s24 }
 0x330   : > { %v1062_v36 = vpop.permute.xlu1 %1061 }
 0x331   : > { %v1073_v38 = vpop.permute.xlu0 %1072  ;;  %1133 = vrot.lane.b32.xlu0 %v1046_v35, %s2185_s24  ;;  %v1066_v22 = vsel %vm662_vm1, %v1062_v36, %v1064_v23  ;;  %v1065_v44 = vsel %vm662_vm1, %v1060_v34, %v1062_v36  ;;  %vm2192_vm1 = vmmov %vm2191_vm14 }
 0x332   : > { %1127 = vrot.lane.b32.xlu1 %v1035_v37, %s2185_s24  ;;  %v1077_v52 = vsel %vm2189_vm4, %v1073_v38, %v1075_v24  ;;  %vm2195_vm3 = vmmov %vm2192_vm1 }
 0x333   : > { %vm2196_vm7 = vmmov %vm2192_vm1 }
 0x334   : > { %v1071_v39 = vpop.permute.xlu1 %1070  ;;  %vm2197_vm0 = vmmov %vm2192_vm1 }
 0x335   : > { %v1083_v21 = vpop.permute.xlu0 %1082  ;;  %1147 = vrot.lane.b32.xlu0 %v1071_v39, %s2185_s24  ;;  %v1076_v42 = vsel %vm2187_vm5, %v1071_v39, %v1073_v38  ;;  %vm2198_vm2 = vmmov %vm2197_vm0  ;;  %v1508_v39 = vld [vmem:[%s2160_s5] ss:$8 sps:$4 sm:$0xff]  }
 0x336   : > { %1131 = vrot.lane.b32.xlu1 %v1045_v40, %s2185_s24  ;;  %v1085_v48 = vsel %vm2188_vm6, %v1081_v33, %v1083_v21  ;;  %vm2199_vm9 = vmmov %vm2197_vm0 }
 0x337   : > { %vm2200_vm8 = vmmov %vm2197_vm0 }
 0x338   : > { %v1090_v19 = vpop.permute.xlu1 %1089  ;;  %vm2201_vm12 = vmmov %vm2197_vm0 }
 0x339   : > { %v1092_v41 = vpop.permute.xlu0 %1091  ;;  %1145 = vrot.lane.b32.xlu0 %v1066_v22, %s2185_s24  ;;  %vm2202_vm15 = vmmov %vm2197_vm0 }
 0x33a   : > { %1155 = vrot.lane.b32.xlu1 %v1084_v16, %s2185_s24  ;;  %v1095_v54 = vsel %vm2193_vm11, %v1090_v19, %v1092_v41  ;;  %vm2203_vm5 = vmmov %vm2197_vm0 }
 0x33b   : > { %vm2204_vm6 = vmmov %vm2197_vm0 }
 0x33c   : > { %v1094_v43 = vpop.permute.xlu1 %1093  ;;  %vm2205_vm4 = vmmov %vm2197_vm0 }
 0x33d   : > { %v1112_v45 = vpop.permute.xlu0 %1111  ;;  %1149 = vrot.lane.b32.xlu0 %v1076_v42, %s2185_s24  ;;  %v1096_v55 = vsel %vm2194_vm10, %v1092_v41, %v1094_v43  ;;  %vm2206_vm13 = vmmov %vm2197_vm0 }
 0x33e   : > { %1143 = vrot.lane.b32.xlu1 %v1065_v44, %s2185_s24  ;;  %vm2209_vm11 = vmmov %vm2197_vm0 }
 0x33f   : > { %vm2210_vm10 = vmmov %vm2197_vm0 }
 0x340   : > { %v1116_v51 = vpop.permute.xlu1 %1115 }
 0x341   : > { %v1114_v1 = vpop.permute.xlu0 %1113  ;;  %1157 = vrot.lane.b32.xlu0 %v1085_v48, %s2185_s24 }
 0x342   : > { %v1165_v53 = vsel %vm2191_vm14, %v1112_v45, %v1114_v1  ;;  %1151 = vrot.lane.b32.xlu1 %v1077_v52, %s2185_s24  ;;  %v1166_v63 = vsel %vm2192_vm1, %v1114_v1, %v1116_v51  ;;  %vm2207_vm14 = vmmov %vm2197_vm0 }
 0x343   : > { %1204 = vmatprep.subr.bf16.mxu0 %v1166_v63  ;;  %vm2208_vm1 = vmmov %vm2197_vm0 }
 0x344   : > { %1205 = vmatpush1.bf16.msra.mxu0 %v1165_v53 }
 0x345   : > { %1161 = vrot.lane.b32.xlu0 %v1095_v54, %s2185_s24 }
 0x346   : > { %1153 = vrot.lane.b32.xlu1 %v1079_v31, %s2185_s24 }
 0x349   : > { %1159 = vrot.lane.b32.xlu0 %v1090_v19, %s2185_s24 }
 0x34a   : > { %1163 = vrot.lane.b32.xlu1 %v1096_v55, %s2185_s24  ;;  %s1515_s24 = scalar_lea.vmem %s1514_s23, 1024 }
 0x34b   : > { %p1517_p2 = scmp.lt.s32.totalorder %s1515_s24, %s1509_s11 }
 0x34d   : > { %1256 = vperm.xlu0 %1496, %v1248_v56   ;;  %p1518_p3 = por %p1517_p2, %p1516_p1 }
 0x34e   : > { %1251 = vperm.xlu1 %1497, %v1247_v57  }
 0x34f   : > { %p1519_p5 = pnand %p1518_p3, %p1512_p0 }
 0x351   : > { %1272 = vperm.xlu0 %1496, %v1264_v58  }
 0x352   : > { %1267 = vperm.xlu1 %1497, %v1263_v3  }
 0x38c   : > { %v1122_v60 = vpop.permute.xlu0 %1121 }
 0x38f   : > { %v1118_v61 = vpop.permute.xlu1 %1117 }
 0x393   : > { %v1136_v62 = vpop.permute.xlu0 %1135  ;;  %v1120_v59 = vpop.permute.xlu1 %1119 }
 0x394   : > { %v1167_v0 = vsel %vm2195_vm3, %v1118_v61, %v1120_v59  ;;  %v1168_v2 = vsel %vm2196_vm7, %v1120_v59, %v1122_v60 }
 0x395   : > { %1206 = vmatprep.subr.bf16.mxu0 %v1168_v2 }
 0x396   : > { %1207 = vmatpush1.bf16.msra.mxu0 %v1167_v0 }
 0x397   : > { %v1124_v4 = vpop.permute.xlu0 %1123 }
 0x398   : > { %v1130_v5 = vpop.permute.xlu1 %1129 }
 0x39b   : > { %v1138_v6 = vpop.permute.xlu0 %1137 }
 0x39c   : > { %v1140_v7 = vpop.permute.xlu1 %1139  ;;  %v1173_v25 = vsel %vm2202_vm15, %v1136_v62, %v1138_v6 }
 0x39d   : > { %v1174_v49 = vsel %vm2201_vm12, %v1138_v6, %v1140_v7 }
 0x39f   : > { %v1126_v8 = vpop.permute.xlu0 %1125 }
 0x3a0   : > { %v1142_v9 = vpop.permute.xlu1 %1141  ;;  %v1169_v15 = vsel %vm2198_vm2, %v1124_v4, %v1126_v8 }
 0x3a3   : > { %v1134_v11 = vpop.permute.xlu0 %1133 }
 0x3a4   : > { %v1128_v13 = vpop.permute.xlu1 %1127 }
 0x3a5   : > { %v1170_v14 = vsel %vm2197_vm0, %v1126_v8, %v1128_v13 }
 0x3a6   : > { %1208 = vmatprep.subr.bf16.mxu0 %v1170_v14 }
 0x3a7   : > { %v1148_v17 = vpop.permute.xlu0 %1147  ;;  %1209 = vmatpush1.bf16.msra.mxu0 %v1169_v15 }
 0x3a8   : > { %v1132_v18 = vpop.permute.xlu1 %1131 }
 0x3a9   : > { %v1171_v20 = vsel %vm2199_vm9, %v1130_v5, %v1132_v18  ;;  %v1172_v23 = vsel %vm2200_vm8, %v1132_v18, %v1134_v11 }
 0x3aa   : > { %1210 = vmatprep.subr.bf16.mxu0 %v1172_v23 }
 0x3ab   : > { %v1146_v24 = vpop.permute.xlu0 %1145  ;;  %1211 = vmatpush1.bf16.msra.mxu0 %v1171_v20 }
 0x3ac   : > { %1212 = vmatprep.subr.bf16.mxu0 %v1174_v49  ;;  %v1156_v10 = vpop.permute.xlu1 %1155 }
 0x3af   : > { %v1150_v46 = vpop.permute.xlu0 %1149  ;;  %1213 = vmatpush1.bf16.msra.mxu0 %v1173_v25 }
 0x3b0   : > { %v1144_v26 = vpop.permute.xlu1 %1143  ;;  %v1177_v12 = vsel %vm2206_vm13, %v1148_v17, %v1150_v46 }
 0x3b1   : > { %v1175_v27 = vsel %vm2203_vm5, %v1142_v9, %v1144_v26  ;;  %v1176_v50 = vsel %vm2204_vm6, %v1144_v26, %v1146_v24 }
 0x3b2   : > { %1214 = vmatprep.subr.bf16.mxu0 %v1176_v50 }
 0x3b3   : > { %v1158_v28 = vpop.permute.xlu0 %1157  ;;  %1215 = vmatpush1.bf16.msra.mxu0 %v1175_v27 }
 0x3b4   : > { %v1152_v29 = vpop.permute.xlu1 %1151  ;;  %v1180_v32 = vsel %vm2207_vm14, %v1156_v10, %v1158_v28 }
 0x3b5   : > { %v1178_v30 = vsel %vm2205_vm4, %v1150_v46, %v1152_v29 }
 0x3b6   : > { %1216 = vmatprep.subr.bf16.mxu0 %v1178_v30 }
 0x3b7   : > { %v1162_v31 = vpop.permute.xlu0 %1161  ;;  %1217 = vmatpush1.bf16.msra.mxu0 %v1177_v12 }
 0x3b8   : > { %1218 = vmatprep.subr.bf16.mxu0 %v1180_v32  ;;  %v1154_v33 = vpop.permute.xlu1 %1153 }
 0x3b9   : > { %v1179_v34 = vsel %vm2208_vm1, %v1154_v33, %v1156_v10 }
 0x3bb   : > { %v1160_v35 = vpop.permute.xlu0 %1159  ;;  %1219 = vmatpush1.bf16.msra.mxu0 %v1179_v34 }
 0x3bc   : > { %v1164_v36 = vpop.permute.xlu1 %1163  ;;  %v1181_v38 = vsel %vm2210_vm10, %v1160_v35, %v1162_v31 }
 0x3bd   : > { %v1182_v37 = vsel %vm2209_vm11, %v1162_v31, %v1164_v36 }
 0x3be   : > { %1220 = vmatprep.subr.bf16.mxu0 %v1182_v37 }
 0x3bf   : > { %1221 = vmatpush1.bf16.msra.mxu0 %v1181_v38 }
 0x3c2   : > { %1237 = vmatmul.mubr.bf16.vlgmr.msra.gmra.mrb[4].mxu0 %v1508_v39 }
 0x3cc   : > { %v1257_v21 = vpop.permute.xlu0 %1256 }
 0x3cd   : > { %v1252_v40 = vpop.permute.xlu1 %1251 }
 0x3d0   : > { %v1273_v48 = vpop.permute.xlu0 %1272 }
 0x3d1   : > { %v1268_v41 = vpop.permute.xlu1 %1267 }
 0x495   : > { %v1238_v22 = vpop.f32.mrb[4].mxu0 }
 0x496   : > { %v1259_v19 = vmul.f32 %v1252_v40, %v1238_v22  ;;  %v1240_v16 = vpop.f32.mrb[5].mxu0 }
 0x497   : > { %v1260_v42 = vmul.f32 %v1252_v40, %v1240_v16  ;;  %v1242_v43 = vpop.f32.mrb[6].mxu0 }
 0x498   : > { %v1275_v44 = vadd.f32 %v1268_v41, %v1259_v19  ;;  %v1261_v45 = vmul.f32 %v1257_v21, %v1242_v43  ;;  %v1244_v47 = vpop.f32.mrb[7].mxu0 }
 0x499   : > { %v1276_v51 = vadd.f32 %v1268_v41, %v1260_v42  ;;  %v1262_v52 = vmul.f32 %v1257_v21, %v1244_v47 }
 0x49a   : > { %v1279_v1 = vmax.f32 %v1275_v44, 0.0  ;;  %v1277_v53 = vadd.f32 %v1273_v48, %v1261_v45 }
 0x49b   : > { %v1280_v63 = vmax.f32 %v1276_v51, 0.0  ;;  %v1278_v54 = vadd.f32 %v1273_v48, %v1262_v52 }
 0x49c   : > { %1283 = vst [vmem:[%s343_s19] sm:$0xff] %v1279_v1  ;;  %v1281_v55 = vmax.f32 %v1277_v53, 0.0 }
 0x49d   : > { %1284 = vst [vmem:[%s343_s19 + $0x8] sm:$0xff] %v1280_v63  ;;  %v1282_v56 = vmax.f32 %v1278_v54, 0.0 }
 0x49e   : > { %1285 = vst [vmem:[%s343_s19 + $0x10] sm:$0xff] %v1281_v55 }
 0x49f   : > { %1286 = vst [vmem:[%s343_s19 + $0x18] sm:$0xff] %v1282_v56 }
 0x4a0   : > { %1522 = shalt.err (!%p1519_p5)
}
 0x4a1   : > { %s1523_s25 = scalar_lea.hbm %s2105_s26, 512  ;;  %s1527_s20 = scalar_lea.hbm %s2163_s8, 1024 }
 0x4a2   : > { %p1524_p6 = scmp.ne.s32.totalorder %s2105_s26, %s1523_s25  ;;  %p1528_p10 = scmp.lt.u32.totalorder %s2105_s26, %s2163_s8 }
 0x4a3   : > { %p1529_p11 = scmp.lt.u32.totalorder %s1527_s20, %s1523_s25  ;;  %p1531_p13 = scmp.lt.u32.totalorder %s1523_s25, %s2105_s26 }
 0x4a4   : > { %p1525_p7 = pnand %p1524_p6, %p1693_p4 }
 0x4a5   : > { %p1530_p12 = por %p1529_p11, %p1528_p10 }
 0x4a6   : > { %p1526_p9 = pneg %p1525_p7 }
 0x4a7   : > { %p1532_p0 = por %p1531_p13, %p1530_p12 }
 0x4a9   : > { %p1533_p1 = pnand %p1532_p0, %p1526_p9 }
 0x4ab   : > { %1536 = shalt.err (!%p1533_p1)
}
 0x4ac   : > { %s1606_s11 = smov 256   ;;  %s1607_s16 = smov 16  }
 0x4ad   : > { %1423 = dma.vmem_to_hbm [thread:$0]  (%p1693_p4), %s2100_s21, 512, %s2105_s26, %s2109_s30, %s1606_s11, %s1606_s11, %s1607_s16  }
 0x4ae PF: > { %p1429_p2 = scmp.ge.s32.totalorder %s1587_s10, 2  ;;  %s1318_s23 = sand.u32 1, %s1567_s27  }
 0x4af   : > { %s1319_s24 = scalar_lea.sflag [#allocation5], %s1318_s23 }
 0x4b0   : > { %p1426_p3 = pnand %p1429_p2, %p1700_p8 }
 0x4b2   : > { %1562 = dma.done.wait (!%p1426_p3), %s1319_s24, 512  }
 0x4b3   : > { %1564 = vsyncadd (!%p1426_p3), %s1319_s24, 4294966784  ;;  %s21_s10 = sadd.s32 1, %s1587_s10   ;;  %s2211_s27 = smov %s1571_s28 }
 0x4b4   : > { %p18_p5 = scmp.ge.s32.totalorder %s21_s10, 4   ;;  %s2212_s28 = smov %s1575_s29 }
 0x4b5   : > { %s2213_s29 = smov %s1706_s18  ;;  %s2214_s30 = smov %s1583_s9 }
 0x4b6   : > { %s2215_s9 = smov %s2217_s13  ;;  %20 = sbr.rel (!%p18_p5) target bundleno = 4 (0x4), region = 94 }
 0x4bd   :  { %1324 = vsyncpa [#allocation5], 1 }
 0x4be   :  { %1326 = vsyncpa [#allocation5 + $0x1], 1 }

</bundles_post_ra>
